<compile_context>
chip_gen: v5e
topology: v5e:2x2
jax: 0.10.0
libtpu: 0.0.40
codegen_flags: <defaults>
</compile_context>

<pallas_src>
import math

import jax
import jax.numpy as jnp
from jax.experimental import pallas as pl
from jax.experimental.pallas import tpu as pltpu


def _make_balanced_l1_kernel(alpha: float, gamma: float, beta: float):
    b = math.e ** (gamma / alpha) - 1.0            # compile-time constants
    alpha_over_b = alpha / b
    lin_const = gamma / b - alpha * beta
    inv_beta = 1.0 / beta

    def kernel(e_ref, w_ref, pred_ref, target_ref, out_ref):
        diff = jnp.abs(pred_ref[...] - target_ref[...])          # (br, L)
        bd = b * diff
        arg = bd if beta == 1.0 else bd * inv_beta
        small = alpha_over_b * (bd + 1.0) * jnp.log1p(arg) - alpha * diff
        large = gamma * diff + lin_const
        loss = jnp.where(diff < beta, small, large)
        # Expand per-sample weights (code_weights folded into E) to per-element
        # lane layout via a one-hot matmul on the otherwise-idle MXU.
        wexp = jnp.dot(w_ref[...], e_ref[...],
                       preferred_element_type=jnp.float32,
                       precision=jax.lax.Precision.HIGHEST)      # (br, L)
        out_ref[...] = loss * wexp

    return kernel


def balanced_l1_loss(pred, target, weights, code_weights,
                     alpha=0.5, gamma=1.5, beta=1.0, max_block_rows=512):
    """pred/target: (B, N, C); weights: (B, N) or None; code_weights: (C,) or None."""
    B, N, C = pred.shape
    pred = pred.astype(jnp.float32)
    target = target.astype(jnp.float32)

    G = 128                       # samples per row (sample weight columns)
    L = G * C                     # lanes per row; multiple of 128 and of C

    S = B * N                     # total samples
    T = S * C                     # total elements
    rows = pl.cdiv(S, G)          # == pl.cdiv(T, L)
    # rows per block: multiple of 8 (sublane alignment), capped for VMEM
    # (512 rows x 128*C lanes x 4 B = 2 MiB per main block at C=8; ~14 MiB
    #  total with double buffering — safe on v5e/v6e/v7x).
    br = min(max_block_rows, max(8, ((rows + 7) // 8) * 8))
    rows_pad = pl.cdiv(rows, br) * br
    S_pad = rows_pad * G
    T_pad = rows_pad * L
    grid = (rows_pad // br,)

    # Lane-dense flattening of pred/target: (B, N, C) -> (rows_pad, L).
    def flat_elems(x):
        x = x.reshape(T)
        if T_pad != T:
            x = jnp.pad(x, (0, T_pad - T))        # zero pad -> zero loss
        return x.reshape(rows_pad, L)

    p2, t2 = flat_elems(pred), flat_elems(target)

    # Per-sample weights: (B, N) -> (rows_pad, G); one weight per C lanes.
    if weights is not None:
        w = weights.astype(jnp.float32).reshape(S)
    else:
        w = jnp.ones((S,), jnp.float32)
    if S_pad != S:
        w = jnp.pad(w, (0, S_pad - S))
    w2 = w.reshape(rows_pad, G)

    # One-hot lane-expansion matrix with code_weights folded in:
    #   E[i, j] = code_weights[j % C] if (j // C == i) else 0,  shape (G, L).
    if code_weights is not None:
        cw = code_weights.astype(jnp.float32).reshape(C)
    else:
        cw = jnp.ones((C,), jnp.float32)
    lane = jnp.arange(L)
    E = jnp.where((lane // C)[None, :] == jnp.arange(G)[:, None],
                  cw[lane % C][None, :], 0.0).astype(jnp.float32)

    kernel = _make_balanced_l1_kernel(float(alpha), float(gamma), float(beta))
    e_spec = pl.BlockSpec((G, L), lambda i: (0, 0))   # constant block: fetched once
    w_spec = pl.BlockSpec((br, G), lambda i: (i, 0))
    x_spec = pl.BlockSpec((br, L), lambda i: (i, 0))

    out = pl.pallas_call(
        kernel,
        out_shape=jax.ShapeDtypeStruct((rows_pad, L), jnp.float32),
        grid_spec=pltpu.PrefetchScalarGridSpec(
            num_scalar_prefetch=0,
            grid=grid,
            in_specs=[e_spec, w_spec, x_spec, x_spec],
            out_specs=x_spec,
        ),
        compiler_params=pltpu.CompilerParams(
            dimension_semantics=("parallel",),        # shards across v7x's 2 TCs
            vmem_limit_bytes=32 * 1024 * 1024,
        ),
    )(E, w2, p2, t2)

    return out.reshape(T_pad)[:T].reshape(B, N, C)


def _reference(pred, target, weights, code_weights, alpha=0.5, gamma=1.5, beta=1.0):
    b = math.e ** (gamma / alpha) - 1.0
    diff = jnp.abs(pred - target)
    loss = jnp.where(
        diff < beta,
        alpha / b * (b * diff + 1.0) * jnp.log(b * diff / beta + 1.0) - alpha * diff,
        gamma * diff + gamma / b - alpha * beta,
    )
    loss = loss * code_weights.reshape(1, 1, -1)
    loss = loss * weights[..., None]
    return loss


if __name__ == "__main__":
    B, N, C = 2, 128, 8  # small shapes: 2 batches, 128 boxes, code size 8

    key = jax.random.PRNGKey(0)
    k1, k2, k3 = jax.random.split(key, 3)
    pred = jax.random.normal(k1, (B, N, C), dtype=jnp.float32) * 2.0
    target = jax.random.normal(k2, (B, N, C), dtype=jnp.float32) * 2.0
    weights = jax.random.uniform(k3, (B, N), dtype=jnp.float32)
    # deterministic code_weights (module __init__ arg), length C
    code_weights = jnp.asarray(
        [1.0, 1.0, 1.0, 1.0, 1.0, 1.0, 0.5, 0.5], dtype=jnp.float32)

    out = balanced_l1_loss(pred, target, weights, code_weights,
                           alpha=0.5, gamma=1.5, beta=1.0)
    out = jax.block_until_ready(out)

    ref = _reference(pred, target, weights, code_weights)
    assert out.shape == (B, N, C)
    assert jnp.allclose(out, ref, atol=1e-5, rtol=1e-5)

    print("KERNEL_OK")
</pallas_src>

<mosaic_0001>
module attributes {stable_mosaic.version = 11 : i64} {
  func.func @kernel(%arg0: i32, %arg1: memref<128x1024xf32, #tpu.memory_space<vmem>>, %arg2: memref<8x128xf32, #tpu.memory_space<vmem>>, %arg3: memref<8x1024xf32, #tpu.memory_space<vmem>>, %arg4: memref<8x1024xf32, #tpu.memory_space<vmem>>, %arg5: memref<8x1024xf32, #tpu.memory_space<vmem>>) attributes {dimension_semantics = [#tpu.dimension_semantics<parallel>], iteration_bounds = array<i64: 1>, scalar_prefetch = 0 : i64, scratch_operands = 0 : i64, tpu.core_type = #tpu.core_type<tc>, window_params = [{pipeline_mode = #tpu.pipeline_mode<synchronous>, transform_indices = @transform_0, window_bounds = array<i64: 128, 1024>}, {transform_indices = @transform_1, window_bounds = array<i64: 8, 128>}, {transform_indices = @transform_2, window_bounds = array<i64: 8, 1024>}, {transform_indices = @transform_3, window_bounds = array<i64: 8, 1024>}, {transform_indices = @transform_4, window_bounds = array<i64: 8, 1024>}]} {
    %c0 = arith.constant 0 : index
    %c0_0 = arith.constant 0 : index
    %0 = vector.load %arg3[%c0, %c0_0] : memref<8x1024xf32, #tpu.memory_space<vmem>>, vector<8x1024xf32>
    %c0_1 = arith.constant 0 : index
    %c0_2 = arith.constant 0 : index
    %1 = vector.load %arg4[%c0_1, %c0_2] : memref<8x1024xf32, #tpu.memory_space<vmem>>, vector<8x1024xf32>
    %2 = arith.subf %0, %1 : vector<8x1024xf32>
    %3 = math.absf %2 : vector<8x1024xf32>
    %cst = arith.constant 19.085537 : f32
    %4 = vector.broadcast %cst : f32 to vector<8x1024xf32>
    %5 = arith.mulf %4, %3 : vector<8x1024xf32>
    %cst_3 = arith.constant 1.000000e+00 : f32
    %6 = vector.broadcast %cst_3 : f32 to vector<8x1024xf32>
    %7 = arith.addf %5, %6 : vector<8x1024xf32>
    %cst_4 = arith.constant 0.0261978488 : f32
    %8 = vector.broadcast %cst_4 : f32 to vector<8x1024xf32>
    %9 = arith.mulf %8, %7 : vector<8x1024xf32>
    %10 = math.log1p %5 : vector<8x1024xf32>
    %11 = arith.mulf %9, %10 : vector<8x1024xf32>
    %cst_5 = arith.constant 5.000000e-01 : f32
    %12 = vector.broadcast %cst_5 : f32 to vector<8x1024xf32>
    %13 = arith.mulf %12, %3 : vector<8x1024xf32>
    %14 = arith.subf %11, %13 : vector<8x1024xf32>
    %cst_6 = arith.constant 1.500000e+00 : f32
    %15 = vector.broadcast %cst_6 : f32 to vector<8x1024xf32>
    %16 = arith.mulf %15, %3 : vector<8x1024xf32>
    %cst_7 = arith.constant -0.421406448 : f32
    %17 = vector.broadcast %cst_7 : f32 to vector<8x1024xf32>
    %18 = arith.addf %16, %17 : vector<8x1024xf32>
    %cst_8 = arith.constant 1.000000e+00 : f32
    %19 = vector.broadcast %cst_8 : f32 to vector<8x1024xf32>
    %20 = arith.cmpf olt, %3, %19 : vector<8x1024xf32>
    %21 = arith.select %20, %14, %18 : vector<8x1024xi1>, vector<8x1024xf32>
    %c0_9 = arith.constant 0 : index
    %c0_10 = arith.constant 0 : index
    %22 = vector.load %arg2[%c0_9, %c0_10] : memref<8x128xf32, #tpu.memory_space<vmem>>, vector<8x128xf32>
    %c0_11 = arith.constant 0 : index
    %c0_12 = arith.constant 0 : index
    %23 = vector.load %arg1[%c0_11, %c0_12] : memref<128x1024xf32, #tpu.memory_space<vmem>>, vector<128x1024xf32>
    %cst_13 = arith.constant dense<0.000000e+00> : vector<8x1024xf32>
    %24 = tpu.matmul %22, %23, %cst_13 {dimension_numbers = #tpu.dot_dimension_numbers<[1], [0], [0], [1], [0, 0, 1, 1], [], []>, precision = #tpu.contract_precision<fp32>} : vector<8x128xf32>, vector<128x1024xf32>, vector<8x1024xf32> -> vector<8x1024xf32>
    %25 = arith.mulf %21, %24 : vector<8x1024xf32>
    %c0_14 = arith.constant 0 : index
    %c0_15 = arith.constant 0 : index
    %26 = vector.load %arg5[%c0_14, %c0_15] : memref<8x1024xf32, #tpu.memory_space<vmem>>, vector<8x1024xf32>
    tpu.vector_store %arg5[%c0_14, %c0_15], %25 {strides = array<i32>} : memref<8x1024xf32, #tpu.memory_space<vmem>>, vector<8x1024xf32>,
    return
  }
  func.func @transform_0(%arg0: i32) -> (i32, i32) {
    %c0_i32 = arith.constant 0 : i32
    %c0_i32_0 = arith.constant 0 : i32
    %c0_i32_1 = arith.constant 0 : i32
    return %c0_i32, %c0_i32_0 : i32, i32
  }
  func.func @transform_1(%arg0: i32) -> (i32, i32) {
    %c0_i32 = arith.constant 0 : i32
    %c0_i32_0 = arith.constant 0 : i32
    return %arg0, %c0_i32 : i32, i32
  }
  func.func @transform_2(%arg0: i32) -> (i32, i32) {
    %c0_i32 = arith.constant 0 : i32
    %c0_i32_0 = arith.constant 0 : i32
    return %arg0, %c0_i32 : i32, i32
  }
  func.func @transform_3(%arg0: i32) -> (i32, i32) {
    %c0_i32 = arith.constant 0 : i32
    %c0_i32_0 = arith.constant 0 : i32
    return %arg0, %c0_i32 : i32, i32
  }
  func.func @transform_4(%arg0: i32) -> (i32, i32) {
    %c0_i32 = arith.constant 0 : i32
    %c0_i32_0 = arith.constant 0 : i32
    return %arg0, %c0_i32 : i32, i32
  }
}

</mosaic_0001>

<bundles_post_ra>
// kernel: tpu_custom_call.1
= control target key start
LH: loop header
LB: loop body
LE: loop exit
PB: predicated region body
PF: predicated region fallthrough
CT: control target
= control target key end

     0   :  { %9 = vsyncpa [#allocation3], 0  ;;  %s5423_s0 = inlined_call_operand.hbm [shape: f32[128,1024], index: 0, kind: input, shape index: {}]   ;;  %s5424_s1 = inlined_call_operand.hbm [shape: f32[8,128], index: 1, kind: input, shape index: {}]   ;;  %s5425_s2 = inlined_call_operand.hbm [shape: f32[8,1024], index: 2, kind: input, shape index: {}]   ;;  %s5426_s3 = inlined_call_operand.hbm [shape: f32[8,1024], index: 3, kind: input, shape index: {}]   ;;  %s5427_s4 = inlined_call_operand.hbm [shape: f32[8,1024], index: 4, kind: output, shape index: {}]  }
   0x1   :  { %10 = vsyncpa [#allocation6], 0 }
   0x2   :  { %11 = vsyncpa [#allocation9], 0  ;;  %s31_s17 = sshll.u32 %s5424_s1, 4  ;;  %s32_s17 = int_to_ptr.hbm [resolvable:$true] %s31_s17 }
   0x3   :  { %12 = vsyncpa [#allocation4], 0  ;;  %s3302_s18 = smov [#allocation5]   ;;  %s17_s22 = sshll.u32 %s5423_s0, 4  ;;  %s18_s22 = int_to_ptr.hbm [resolvable:$true] %s17_s22 }
   0x4   :  { %s33_s19 = sshll.u32 %s3302_s18, 4  ;;  %s3303_s23 = smov [#allocation2]   ;;  %s34_s19 = int_to_ptr.vmem [resolvable:$true] %s33_s19 }
   0x5   :  { %36 = dma.hbm_to_vmem [thread:$0]  %s32_s17, 128, %s34_s19, [#allocation6]  }
   0x6   :  { %s19_s24 = sshll.u32 %s3303_s23, 4  ;;  %s3304_s25 = smov 1024   ;;  %s20_s24 = int_to_ptr.vmem [resolvable:$true] %s19_s24 }
   0x7   :  { %s3305_s26 = smov 64   ;;  %s42_s1 = sshll.u32 %s5425_s2, 4  ;;  %s43_s1 = int_to_ptr.hbm [resolvable:$true] %s42_s1 }
   0x8   :  { %25 = dma.hbm_to_vmem [thread:$0]  %s18_s22, 16384, %s20_s24, [#allocation3], %s3304_s25, %s3304_s25, %s3305_s26  }
   0x9   :  { %s3306_s29 = smov [#allocation7]   ;;  %s53_s0 = sshll.u32 %s5426_s3, 4  ;;  %s54_s0 = int_to_ptr.hbm [resolvable:$true] %s53_s0 }
   0xa   :  { %s44_s30 = sshll.u32 %s3306_s29, 4  ;;  %s3307_s7 = smov [#allocation8]   ;;  %s45_s30 = int_to_ptr.vmem [resolvable:$true] %s44_s30 }
   0xb   :  { %47 = dma.hbm_to_vmem [thread:$0]  %s43_s1, 1024, %s45_s30, [#allocation6]  }
   0xc   :  { %s55_s8 = sshll.u32 %s3307_s7, 4  ;;  %s56_s8 = int_to_ptr.vmem [resolvable:$true] %s55_s8 }
   0xd   :  { %58 = dma.hbm_to_vmem [thread:$0]  %s54_s0, 1024, %s56_s8, [#allocation9]  }
   0xe   :  { %3294 = dma.done.wait [#allocation3], 16384  }
   0xf   :  { %3295 = vsyncadd [#allocation3], 4294950912 }
  0x10   :  { %3296 = dma.done.wait [#allocation6], 1152  }
  0x11   :  { %3297 = vsyncadd [#allocation6], 4294966144 }
  0x12   :  { %3298 = dma.done.wait [#allocation9], 1024  }
  0x13   :  { %3299 = vsyncadd [#allocation9], 4294966272  ;;  %v380_v0 = vld [vmem:[#allocation2 + $0x3c0] sm:$0xff]  ;;  %v381_v55 = vld [vmem:[#allocation2 + $0x3c8] sm:$0xff]  ;;  %s3308_s2 = smov [#allocation10]   ;;  %s3139_s11 = sshll.u32 %s5427_s4, 4  ;;  %s3140_s11 = int_to_ptr.hbm [resolvable:$true] %s3139_s11 }
  0x14   :  { %v372_v1 = vld [vmem:[#allocation2 + $0x380] sm:$0xff]  ;;  %v3346_v3 = vand.u32 4294901760, %v380_v0  ;;  %v373_v63 = vld [vmem:[#allocation2 + $0x388] sm:$0xff]  ;;  %s3137_s3 = sshll.u32 %s3308_s2, 4  ;;  %s3138_s3 = int_to_ptr.vmem [resolvable:$true] %s3137_s3 }
  0x15   :  { %v364_v2 = vld [vmem:[#allocation2 + $0x340] sm:$0xff]  ;;  %v3348_v4 = vand.u32 4294901760, %v372_v1 }
  0x16   :  { %v3350_v5 = vand.u32 4294901760, %v364_v2  ;;  %v356_v6 = vld [vmem:[#allocation2 + $0x300] sm:$0xff]  ;;  %389 = vmatpush.msra.mxu0 %v3346_v3  ;;  %v3360_v14 = vsub.f32 %v380_v0, %v3346_v3  ;;  %585 = vmatpush.msra.mxu3 %v3346_v3 }
  0x17   :  { %v348_v7 = vld [vmem:[#allocation2 + $0x2c0] sm:$0xff]  ;;  %v3352_v9 = vand.u32 4294901760, %v356_v6  ;;  %v3363_v15 = vsub.f32 %v372_v1, %v3348_v4 }
  0x18   :  { %v340_v8 = vld [vmem:[#allocation2 + $0x280] sm:$0xff]  ;;  %v3354_v10 = vand.u32 4294901760, %v348_v7  ;;  %v3367_v16 = vsub.f32 %v364_v2, %v3350_v5  ;;  %532 = vmatpush.msra.mxu2 %v3360_v14  ;;  %391 = vmatpush.msra.mxu0 %v3348_v4  ;;  %v5442_v22 = vand.u32 4294901760, %v3360_v14 }
  0x19   :  { %v3356_v11 = vand.u32 4294901760, %v340_v8  ;;  %v332_v12 = vld [vmem:[#allocation2 + $0x240] sm:$0xff]  ;;  %v3372_v18 = vsub.f32 %v356_v6, %v3352_v9  ;;  %v5441_v23 = vand.u32 4294901760, %v3363_v15  ;;  %587 = vmatpush.msra.mxu3 %v3348_v4 }
  0x1a   :  { %v324_v13 = vld [vmem:[#allocation2 + $0x200] sm:$0xff]  ;;  %v3369_v17 = vand.u32 4294901760, %v332_v12  ;;  %v3375_v19 = vsub.f32 %v348_v7, %v3354_v10  ;;  %v5440_v24 = vand.u32 4294901760, %v3367_v16  ;;  %535 = vmatpush.msra.mxu2 %v3363_v15  ;;  %393 = vmatpush.msra.mxu0 %v3350_v5  ;;  %v432_v29 = vsub.f32 %v3360_v14, %v5442_v22 }
  0x1b   :  { %v3378_v20 = vsub.f32 %v340_v8, %v3356_v11  ;;  %v316_v21 = vld [vmem:[#allocation2 + $0x1c0] sm:$0xff]  ;;  %v3385_v25 = vand.u32 4294901760, %v324_v13  ;;  %v5437_v26 = vand.u32 4294901760, %v3372_v18  ;;  %v438_v30 = vsub.f32 %v3363_v15, %v5441_v23  ;;  %589 = vmatpush.msra.mxu3 %v3350_v5 }
  0x1c   :  { %v5436_v27 = vand.u32 4294901760, %v3375_v19  ;;  %v3391_v28 = vsub.f32 %v332_v12, %v3369_v17  ;;  %v444_v31 = vsub.f32 %v3367_v16, %v5440_v24  ;;  %v3404_v32 = vand.u32 4294901760, %v316_v21  ;;  %v308_v34 = vld [vmem:[#allocation2 + $0x180] sm:$0xff]  ;;  %538 = vmatpush.msra.mxu2 %v3367_v16  ;;  %395 = vmatpush.msra.mxu0 %v3352_v9 }
  0x1d   :  { %v5434_v33 = vand.u32 4294901760, %v3378_v20  ;;  %v300_v35 = vld [vmem:[#allocation2 + $0x140] sm:$0xff]  ;;  %v433_v36 = vand.u32 4294901760, %v432_v29  ;;  %v439_v37 = vand.u32 4294901760, %v438_v30  ;;  %v450_v38 = vsub.f32 %v3372_v18, %v5437_v26  ;;  %591 = vmatpush.msra.mxu3 %v3352_v9 }
  0x1e   :  { %v3414_v39 = vsub.f32 %v324_v13, %v3385_v25  ;;  %v292_v40 = vld [vmem:[#allocation2 + $0x100] sm:$0xff]  ;;  %v456_v41 = vsub.f32 %v3375_v19, %v5436_v27  ;;  %v3421_v42 = vsub.f32 %v316_v21, %v3404_v32  ;;  %541 = vmatpush.msra.mxu2 %v3372_v18  ;;  %v445_v43 = vand.u32 4294901760, %v444_v31  ;;  %397 = vmatpush.msra.mxu0 %v3354_v10  ;;  %v365_v13 = vld [vmem:[#allocation2 + $0x348] sm:$0xff] }
  0x1f   :  { %434 = vmatpush.msra.mxu1 %v433_v36  ;;  %v5433_v44 = vand.u32 4294901760, %v3391_v28  ;;  %v3425_v45 = vand.u32 4294901760, %v308_v34  ;;  %v3427_v46 = vand.u32 4294901760, %v300_v35  ;;  %593 = vmatpush.msra.mxu3 %v3354_v10  ;;  %v3431_v47 = vand.u32 4294901760, %v292_v40  ;;  %v284_v48 = vld [vmem:[#allocation2 + $0xc0] sm:$0xff] }
  0x20   :  { %544 = vmatpush.msra.mxu2 %v3375_v19  ;;  %v451_v49 = vand.u32 4294901760, %v450_v38  ;;  %v462_v50 = vsub.f32 %v3378_v20, %v5434_v33  ;;  %v5432_v51 = vand.u32 4294901760, %v3414_v39  ;;  %v276_v53 = vld [vmem:[#allocation2 + $0x80] sm:$0xff]  ;;  %399 = vmatpush.msra.mxu0 %v3356_v11  ;;  %v5430_v54 = vand.u32 4294901760, %v3421_v42  ;;  %v325_v33 = vld [vmem:[#allocation2 + $0x208] sm:$0xff] }
  0x21   :  { %440 = vmatpush.msra.mxu1 %v439_v37  ;;  %v3439_v52 = vsub.f32 %v308_v34, %v3425_v45  ;;  %595 = vmatpush.msra.mxu3 %v3356_v11  ;;  %v457_v56 = vand.u32 4294901760, %v456_v41  ;;  %v468_v57 = vsub.f32 %v3391_v28, %v5433_v44  ;;  %v3449_v58 = vsub.f32 %v300_v35, %v3427_v46  ;;  %v268_v60 = vld [vmem:[#allocation2 + $0x40] sm:$0xff]  ;;  %v357_v37 = vld [vmem:[#allocation2 + $0x308] sm:$0xff] }
  0x22   :  { %547 = vmatpush.msra.mxu2 %v3378_v20  ;;  %v3451_v59 = vand.u32 4294901760, %v284_v48  ;;  %401 = vmatpush.msra.mxu0 %v3369_v17  ;;  %v3456_v61 = vsub.f32 %v292_v40, %v3431_v47  ;;  %v3458_v62 = vand.u32 4294901760, %v276_v53  ;;  %v463_v0 = vand.u32 4294901760, %v462_v50  ;;  %v260_v6 = vld [vmem:[#allocation2] sm:$0xff]  ;;  %v349_v50 = vld [vmem:[#allocation2 + $0x2c8] sm:$0xff] }
  0x23   :  { %446 = vmatpush.msra.mxu1 %v445_v43  ;;  %597 = vmatpush.msra.mxu3 %v3369_v17  ;;  %v474_v1 = vsub.f32 %v3414_v39, %v5432_v51  ;;  %v5429_v2 = vand.u32 4294901760, %v3439_v52  ;;  %v3465_v7 = vand.u32 4294901760, %v381_v55  ;;  %v480_v8 = vsub.f32 %v3421_v42, %v5430_v54  ;;  %v333_v54 = vld [vmem:[#allocation2 + $0x248] sm:$0xff] }
  0x24   :  { %550 = vmatpush.msra.mxu2 %v3391_v28  ;;  %403 = vmatpush.msra.mxu0 %v3385_v25  ;;  %v3472_v12 = vand.u32 4294901760, %v268_v60  ;;  %v469_v21 = vand.u32 4294901760, %v468_v57  ;;  %v5428_v29 = vand.u32 4294901760, %v3449_v58  ;;  %v3477_v30 = vsub.f32 %v284_v48, %v3451_v59 }
  0x25   :  { %452 = vmatpush.msra.mxu1 %v451_v49  ;;  %599 = vmatpush.msra.mxu3 %v3385_v25  ;;  %v3479_v31 = vand.u32 4294901760, %v373_v63  ;;  %v5431_v34 = vand.u32 4294901760, %v3456_v61  ;;  %v3485_v35 = vsub.f32 %v276_v53, %v3458_v62  ;;  %v3487_v36 = vand.u32 4294901760, %v260_v6 }
  0x26   :  { %5547 = vst [vmem:[#allocation15_spill] sm:$0xff] %v3472_v12  ;;  %553 = vmatpush.msra.mxu2 %v3414_v39  ;;  %405 = vmatpush.msra.mxu0 %v3404_v32  ;;  %v475_v38 = vand.u32 4294901760, %v474_v1  ;;  %v486_v40 = vsub.f32 %v3439_v52, %v5429_v2  ;;  %v3494_v41 = vsub.f32 %v381_v55, %v3465_v7  ;;  %v3496_v43 = vand.u32 4294901760, %v365_v13 }
  0x27   :  { %458 = vmatpush.msra.mxu1 %v457_v56  ;;  %601 = vmatpush.msra.mxu3 %v3404_v32  ;;  %5548 = vst [vmem:[#allocation16_spill] sm:$0xff] %v3487_v36  ;;  %v481_v48 = vand.u32 4294901760, %v480_v8  ;;  %v3501_v49 = vsub.f32 %v268_v60, %v3472_v12  ;;  %v492_v53 = vsub.f32 %v3449_v58, %v5428_v29  ;;  %v5435_v55 = vand.u32 4294901760, %v3477_v30 }
  0x28   :  { %556 = vmatpush.msra.mxu2 %v3421_v42  ;;  %407 = vmatpush.msra.mxu0 %v3425_v45  ;;  %v3509_v56 = vsub.f32 %v373_v63, %v3479_v31  ;;  %v3511_v57 = vand.u32 4294901760, %v357_v37  ;;  %v498_v60 = vsub.f32 %v3456_v61, %v5431_v34  ;;  %v5438_v1 = vand.u32 4294901760, %v3485_v35 }
  0x29   :  { %464 = vmatpush.msra.mxu1 %v463_v0  ;;  %603 = vmatpush.msra.mxu3 %v3425_v45  ;;  %v341_v0 = vld [vmem:[#allocation2 + $0x288] sm:$0xff]  ;;  %v3520_v8 = vsub.f32 %v260_v6, %v3487_v36  ;;  %v487_v63 = vand.u32 4294901760, %v486_v40  ;;  %v3525_v29 = vsub.f32 %v365_v13, %v3496_v43  ;;  %v3527_v2 = vand.u32 4294901760, %v349_v50 }
  0x2a   :  { %559 = vmatpush.msra.mxu2 %v3439_v52  ;;  %5549 = vst [vmem:[#allocation17_spill] sm:$0xff] %v3509_v56  ;;  %409 = vmatpush.msra.mxu0 %v3427_v46  ;;  %v5444_v34 = vand.u32 4294901760, %v3501_v49  ;;  %v3532_v6 = vand.u32 4294901760, %v341_v0  ;;  %v504_v13 = vsub.f32 %v3477_v30, %v5435_v55  ;;  %v5443_v40 = vand.u32 4294901760, %v3509_v56 }
  0x2b   :  { %470 = vmatpush.msra.mxu1 %v469_v21  ;;  %605 = vmatpush.msra.mxu3 %v3427_v46  ;;  %v5439_v21 = vand.u32 4294901760, %v3494_v41  ;;  %5550 = vst [vmem:[#allocation18_spill] sm:$0xff] %v3525_v29  ;;  %v3540_v51 = vsub.f32 %v357_v37, %v3511_v57  ;;  %v5447_v44 = vand.u32 4294901760, %v3520_v8  ;;  %v499_v55 = vand.u32 4294901760, %v498_v60  ;;  %v317_v60 = vld [vmem:[#allocation2 + $0x1c8] sm:$0xff] }
  0x2c   :  { %562 = vmatpush.msra.mxu2 %v3449_v58  ;;  %411 = vmatpush.msra.mxu0 %v3431_v47  ;;  %v5448_v27 = vand.u32 4294901760, %v3525_v29  ;;  %v3556_v26 = vsub.f32 %v349_v50, %v3527_v2  ;;  %v779_v50 = vsub.f32 %v3509_v56, %v5443_v40  ;;  %v3571_v23 = vand.u32 4294901760, %v325_v33 }
  0x2d   :  { %476 = vmatpush.msra.mxu1 %v475_v38  ;;  %607 = vmatpush.msra.mxu3 %v3431_v47  ;;  %v493_v38 = vand.u32 4294901760, %v492_v53  ;;  %5551 = vst [vmem:[#allocation19_spill] sm:$0xff] %v3540_v51  ;;  %v3548_v53 = vand.u32 4294901760, %v333_v54  ;;  %v773_v37 = vsub.f32 %v3494_v41, %v5439_v21  ;;  %v505_v21 = vand.u32 4294901760, %v504_v13  ;;  %v309_v13 = vld [vmem:[#allocation2 + $0x188] sm:$0xff] }
  0x2e   :  { %565 = vmatpush.msra.mxu2 %v3456_v61  ;;  %413 = vmatpush.msra.mxu0 %v3451_v59  ;;  %v3586_v24 = vand.u32 4294901760, %v317_v60 }
  0x2f   :  { %482 = vmatpush.msra.mxu1 %v481_v48  ;;  %609 = vmatpush.msra.mxu3 %v3451_v59  ;;  %v510_v48 = vsub.f32 %v3485_v35, %v5438_v1  ;;  %v3564_v1 = vsub.f32 %v341_v0, %v3532_v6  ;;  %v522_v0 = vsub.f32 %v3520_v8, %v5447_v44  ;;  %v774_v40 = vand.u32 4294901760, %v773_v37  ;;  %v301_v44 = vld [vmem:[#allocation2 + $0x148] sm:$0xff] }
  0x30   :  { %568 = vmatpush.msra.mxu2 %v3477_v30  ;;  %415 = vmatpush.msra.mxu0 %v3458_v62  ;;  %v5552_v37 = vand.u32 4294901760, %v3540_v51 }
  0x31   :  { %488 = vmatpush.msra.mxu1 %v487_v63  ;;  %611 = vmatpush.msra.mxu3 %v3458_v62  ;;  %v516_v63 = vsub.f32 %v3501_v49, %v5444_v34  ;;  %v511_v22 = vand.u32 4294901760, %v510_v48  ;;  %v785_v34 = vsub.f32 %v3525_v29, %v5448_v27  ;;  %v3596_v48 = vsub.f32 %v325_v33, %v3571_v23 }
  0x32   :  { %571 = vmatpush.msra.mxu2 %v3485_v35  ;;  %417 = vmatpush.msra.mxu0 %v3472_v12  ;;  %v791_v27 = vsub.f32 %v3540_v51, %v5552_v37  ;;  %v3598_v29 = vand.u32 4294901760, %v309_v13  ;;  %v3608_v33 = vsub.f32 %v317_v60, %v3586_v24  ;;  %v3610_v51 = vand.u32 4294901760, %v301_v44 }
  0x33   :  { %494 = vmatpush.msra.mxu1 %v493_v38  ;;  %613 = vmatpush.msra.mxu3 %v3472_v12  ;;  %v3579_v38 = vsub.f32 %v333_v54, %v3548_v53  ;;  %v517_v56 = vand.u32 4294901760, %v516_v63  ;;  %v5553_v63 = vand.u32 4294901760, %v3360_v14  ;;  %v523_v54 = vand.u32 4294901760, %v522_v0 }
  0x34   :  { %574 = vmatpush.msra.mxu2 %v3501_v49  ;;  %419 = vmatpush.msra.mxu0 %v3487_v36  ;;  %v5554_v12 = vand.u32 4294901760, %v3556_v26  ;;  %v5555_v14 = vand.u32 4294901760, %v3363_v15  ;;  %v5556_v0 = vand.u32 4294901760, %v3564_v1  ;;  %v3620_v60 = vsub.f32 %v309_v13, %v3598_v29 }
  0x35   :  { %500 = vmatpush.msra.mxu1 %v499_v55  ;;  %615 = vmatpush.msra.mxu3 %v3487_v36  ;;  %v780_v55 = vand.u32 4294901760, %v779_v50  ;;  %v293_v36 = vld [vmem:[#allocation2 + $0x108] sm:$0xff]  ;;  %v786_v50 = vand.u32 4294901760, %v785_v34  ;;  %v792_v34 = vand.u32 4294901760, %v791_v27  ;;  %v5557_v15 = vand.u32 4294901760, %v3367_v16 }
  0x36   :  { %577 = vmatpush.msra.mxu2 %v3520_v8  ;;  %626 = vmatpush.msrb.mxu0 %v5553_v63  ;;  %v797_v37 = vsub.f32 %v3556_v26, %v5554_v12  ;;  %v3622_v63 = vand.u32 4294901760, %v293_v36  ;;  %v3632_v13 = vsub.f32 %v301_v44, %v3610_v51  ;;  %v5558_v16 = vand.u32 4294901760, %v3372_v18  ;;  %v269_v12 = vld [vmem:[#allocation2 + $0x48] sm:$0xff] }
  0x37   :  { %506 = vmatpush.msra.mxu1 %v505_v21  ;;  %v5455_v21 = vand.u32 4294901760, %v3579_v38  ;;  %775 = vmatpush.msrb.mxu3 %v774_v40  ;;  %v285_v40 = vld [vmem:[#allocation2 + $0xc8] sm:$0xff] }
  0x38   :  { %730 = vmatpush.msrb.mxu2 %v3465_v7  ;;  %630 = vmatpush.msrb.mxu0 %v5555_v14  ;;  %v798_v27 = vand.u32 4294901760, %v797_v37  ;;  %v826_v37 = vand.u32 4294901760, %v3620_v60  ;;  %v3645_v44 = vsub.f32 %v293_v36, %v3622_v63 }
  0x39   :  { %512 = vmatpush.msra.mxu1 %v511_v22  ;;  %v803_v22 = vsub.f32 %v3564_v1, %v5556_v0  ;;  %781 = vmatpush.msrb.mxu3 %v780_v55  ;;  %v809_v14 = vsub.f32 %v3579_v38, %v5455_v21  ;;  %v277_v0 = vld [vmem:[#allocation2 + $0x88] sm:$0xff]  ;;  %v3634_v55 = vand.u32 4294901760, %v285_v40 }
  0x3a   :  { %732 = vmatpush.msrb.mxu2 %v3479_v31  ;;  %634 = vmatpush.msrb.mxu0 %v5557_v15  ;;  %v3647_v21 = vand.u32 4294901760, %v277_v0 }
  0x3b   :  { %518 = vmatpush.msra.mxu1 %v517_v56  ;;  %787 = vmatpush.msrb.mxu3 %v786_v50  ;;  %v820_v56 = vand.u32 4294901760, %v3608_v33  ;;  %v804_v15 = vand.u32 4294901760, %v803_v22  ;;  %v810_v18 = vand.u32 4294901760, %v809_v14  ;;  %v3658_v36 = vsub.f32 %v285_v40, %v3634_v55 }
  0x3c   :  { %734 = vmatpush.msrb.mxu2 %v3496_v43  ;;  %638 = vmatpush.msrb.mxu0 %v5558_v16  ;;  %v3660_v16 = vand.u32 4294901760, %v269_v12  ;;  %v827_v14 = vsub.f32 %v3620_v60, %v826_v37  ;;  %v3671_v40 = vsub.f32 %v277_v0, %v3647_v21 }
  0x3d   :  { %524 = vmatpush.msra.mxu1 %v523_v54  ;;  %793 = vmatpush.msrb.mxu3 %v792_v34  ;;  %v5559_v54 = vand.u32 4294901760, %v3596_v48  ;;  %v821_v22 = vsub.f32 %v3608_v33, %v820_v56  ;;  %v832_v34 = vand.u32 4294901760, %v3632_v13 }
  0x3e   :  { %736 = vmatpush.msrb.mxu2 %v3511_v57  ;;  %v3684_v0 = vsub.f32 %v269_v12, %v3660_v16  ;;  %v5565_v12 = vand.u32 4294901760, %v3421_v42 }
  0x3f   :  { %693 = vmatpush.msrb.mxu1 %v3346_v3  ;;  %v815_v50 = vsub.f32 %v3596_v48, %v5559_v54  ;;  %v5560_v3 = vand.u32 4294901760, %v3375_v19  ;;  %799 = vmatpush.msrb.mxu3 %v798_v27  ;;  %v259_v54 = vld [vmem:[#allocation5] sm:$0xff]  ;;  %v838_v27 = vand.u32 4294901760, %v3645_v44 }
  0x40   :  { %738 = vmatpush.msrb.mxu2 %v3527_v2 }
  0x41   :  { %695 = vmatpush.msrb.mxu1 %v3348_v4  ;;  %642 = vmatpush.msrb.mxu0 %v5560_v3  ;;  %v5561_v4 = vand.u32 4294901760, %v3378_v20  ;;  %v816_v19 = vand.u32 4294901760, %v815_v50  ;;  %v3676_v20 = vand.u32 4294901760, %v259_v54  ;;  %v261_v3 = vld [vmem:[#allocation2 + $0x8] sm:$0xff]  ;;  %v833_v50 = vsub.f32 %v3632_v13, %v832_v34 }
  0x42   :  { %740 = vmatpush.msrb.mxu2 %v3532_v6  ;;  %805 = vmatpush.msrb.mxu3 %v804_v15  ;;  %v822_v15 = vand.u32 4294901760, %v821_v22  ;;  %v850_v22 = vand.u32 4294901760, %v3671_v40 }
  0x43   :  { %697 = vmatpush.msrb.mxu1 %v3350_v5  ;;  %646 = vmatpush.msrb.mxu0 %v5561_v4  ;;  %v5562_v5 = vand.u32 4294901760, %v3391_v28  ;;  %5563 = vst [vmem:[#allocation20_spill] sm:$0xff] %v3676_v20  ;;  %v844_v4 = vand.u32 4294901760, %v3658_v36  ;;  %v828_v28 = vand.u32 4294901760, %v827_v14  ;;  %v856_v14 = vand.u32 4294901760, %v3684_v0 }
  0x44   :  { %742 = vmatpush.msrb.mxu2 %v3548_v53  ;;  %811 = vmatpush.msrb.mxu3 %v810_v18  ;;  %v839_v18 = vsub.f32 %v3645_v44, %v838_v27 }
  0x45   :  { %699 = vmatpush.msrb.mxu1 %v3352_v9  ;;  %650 = vmatpush.msrb.mxu0 %v5562_v5  ;;  %v5564_v9 = vand.u32 4294901760, %v3414_v39  ;;  %v3694_v5 = vand.u32 4294901760, %v261_v3  ;;  %v834_v39 = vand.u32 4294901760, %v833_v50  ;;  %v5568_v50 = vand.u32 4294901760, %v3449_v58 }
  0x46   :  { %744 = vmatpush.msrb.mxu2 %v3571_v23  ;;  %817 = vmatpush.msrb.mxu3 %v816_v19  ;;  %v845_v19 = vsub.f32 %v3658_v36, %v844_v4  ;;  %v840_v42 = vand.u32 4294901760, %v839_v18 }
  0x47   :  { %701 = vmatpush.msrb.mxu1 %v3354_v10  ;;  %654 = vmatpush.msrb.mxu0 %v5564_v9  ;;  %v3700_v10 = vsub.f32 %v259_v54, %v3676_v20  ;;  %v851_v54 = vsub.f32 %v3671_v40, %v850_v22  ;;  %v857_v9 = vsub.f32 %v3684_v0, %v856_v14 }
  0x48   :  { %746 = vmatpush.msrb.mxu2 %v3586_v24  ;;  %823 = vmatpush.msrb.mxu3 %v822_v15  ;;  %v3715_v15 = vsub.f32 %v261_v3, %v3694_v5  ;;  %v5570_v3 = vand.u32 4294901760, %v3456_v61  ;;  %v5572_v61 = vand.u32 4294901760, %v3485_v35 }
  0x49   :  { %703 = vmatpush.msrb.mxu1 %v3356_v11  ;;  %658 = vmatpush.msrb.mxu0 %v5565_v12  ;;  %5566 = vst [vmem:[#allocation21_spill] sm:$0xff] %v3700_v10  ;;  %v5567_v11 = vand.u32 4294901760, %v3439_v52  ;;  %v846_v52 = vand.u32 4294901760, %v845_v19  ;;  %v5583_v19 = vld [vmem:[#allocation19_spill] sm:$0xff] }
  0x4a   :  { %748 = vmatpush.msrb.mxu2 %v3598_v29  ;;  %829 = vmatpush.msrb.mxu3 %v828_v28  ;;  %v862_v58 = vand.u32 4294901760, %v3715_v15  ;;  %v5571_v28 = vand.u32 4294901760, %v3477_v30  ;;  %v5573_v30 = vand.u32 4294901760, %v3501_v49  ;;  %v5578_v49 = vld [vmem:[#allocation17_spill] sm:$0xff] }
  0x4b   :  { %705 = vmatpush.msrb.mxu1 %v3369_v17  ;;  %662 = vmatpush.msrb.mxu0 %v5567_v11  ;;  %v3721_v17 = vand.u32 4294901760, %v3700_v10  ;;  %v5584_v11 = vand.u32 4294901760, %v5583_v19 }
  0x4c   :  { %750 = vmatpush.msrb.mxu2 %v3610_v51  ;;  %835 = vmatpush.msrb.mxu3 %v834_v39  ;;  %v5581_v39 = vld [vmem:[#allocation18_spill] sm:$0xff] }
  0x4d   :  { %707 = vmatpush.msrb.mxu1 %v3385_v25  ;;  %666 = vmatpush.msrb.mxu0 %v5568_v50  ;;  %5569 = vst [vmem:[#allocation22_spill] sm:$0xff] %v3721_v17  ;;  %v852_v25 = vand.u32 4294901760, %v851_v54  ;;  %v423_v18 = vsub.f32 %v3700_v10, %v3721_v17  ;;  %v310_v50 = vld [vmem:[#allocation2 + $0x190] sm:$0xff] }
  0x4e   :  { %752 = vmatpush.msrb.mxu2 %v3622_v63  ;;  %841 = vmatpush.msrb.mxu3 %v840_v42 }
  0x4f   :  { %709 = vmatpush.msrb.mxu1 %v3404_v32  ;;  %670 = vmatpush.msrb.mxu0 %v5570_v3  ;;  %v858_v32 = vand.u32 4294901760, %v857_v9  ;;  %v3748_v12 = vand.u32 4294901760, %v423_v18 }
  0x50   :  { %754 = vmatpush.msrb.mxu2 %v3634_v55  ;;  %847 = vmatpush.msrb.mxu3 %v846_v52 }
  0x51   :  { %711 = vmatpush.msrb.mxu1 %v3425_v45  ;;  %674 = vmatpush.msrb.mxu0 %v5571_v28  ;;  %v863_v45 = vsub.f32 %v3715_v15, %v862_v58  ;;  %5574 = vst [vmem:[#allocation23_spill] sm:$0xff] %v3748_v12 }
  0x52   :  { %756 = vmatpush.msrb.mxu2 %v3647_v21  ;;  %853 = vmatpush.msrb.mxu3 %v852_v25 }
  0x53   :  { %713 = vmatpush.msrb.mxu1 %v3427_v46  ;;  %678 = vmatpush.msrb.mxu0 %v5572_v61  ;;  %v5575_v46 = vand.u32 4294901760, %v3520_v8  ;;  %v864_v35 = vand.u32 4294901760, %v863_v45  ;;  %v5579_v8 = vand.u32 4294901760, %v5578_v49  ;;  %v294_v61 = vld [vmem:[#allocation2 + $0x110] sm:$0xff] }
  0x54   :  { %758 = vmatpush.msrb.mxu2 %v3660_v16  ;;  %859 = vmatpush.msrb.mxu3 %v858_v32  ;;  %v3912_v32 = vand.u32 4294901760, %v310_v50 }
  0x55   :  { %715 = vmatpush.msrb.mxu1 %v3431_v47  ;;  %682 = vmatpush.msrb.mxu0 %v5573_v30  ;;  %v5576_v47 = vand.u32 4294901760, %v3494_v41 }
  0x56   :  { %580 = vmatmul.f32.vlgmr.msra.gmra.mxu2 %v3700_v10  ;;  %425 = vmatmul.f32.vlgmr.msra.gmra.mxu0 %v3748_v12 }
  0x57   :  { %717 = vmatpush.msrb.mxu1 %v3451_v59  ;;  %686 = vmatpush.msrb.mxu0 %v5575_v46  ;;  %v5577_v59 = vld [vmem:[#allocation15_spill] sm:$0xff] }
  0x58   :  { %760 = vmatpush.msrb.mxu2 %v3694_v5  ;;  %619 = vmatmul.f32.vlgmr.msra.gmra.mxu3 %v3721_v17 }
  0x59   :  { %719 = vmatpush.msrb.mxu1 %v3458_v62  ;;  %873 = vmatpush.msra.mxu0 %v3494_v41  ;;  %v5580_v62 = vld [vmem:[#allocation16_spill] sm:$0xff]  ;;  %v5582_v41 = vand.u32 4294901760, %v5581_v39 }
  0x5a   :  { %967 = vmatpush.msra.mxu2 %v5576_v47  ;;  %865 = vmatpush.msrb.mxu3 %v864_v35 }
  0x5b   :  { %721 = vmatpush.msrb.mxu1 %v5577_v59  ;;  %876 = vmatpush.msra.mxu0 %v5578_v49  ;;  %v286_v59 = vld [vmem:[#allocation2 + $0xd0] sm:$0xff] }
  0x5c   :  { %526 = vmatmul.f32.vlgmr.msra.gmra.mxu1 %v3676_v20  ;;  %971 = vmatpush.msra.mxu2 %v5579_v8 }
  0x5d   :  { %1034 = vmatpush.msra.mxu3 %v3465_v7  ;;  %723 = vmatpush.msrb.mxu1 %v5580_v62  ;;  %v3935_v62 = vsub.f32 %v310_v50, %v3912_v32 }
  0x5e   :  { %879 = vmatpush.msra.mxu0 %v5581_v39  ;;  %975 = vmatpush.msra.mxu2 %v5582_v41  ;;  %v3937_v39 = vand.u32 4294901760, %v294_v61 }
  0x5f   :  { %926 = vmatpush.msra.mxu1 %v3465_v7  ;;  %1036 = vmatpush.msra.mxu3 %v3479_v31  ;;  %v5585_v7 = vand.u32 4294901760, %v3556_v26 }
  0x60   :  { %882 = vmatpush.msra.mxu0 %v5583_v19  ;;  %979 = vmatpush.msra.mxu2 %v5584_v11  ;;  %v278_v19 = vld [vmem:[#allocation2 + $0x90] sm:$0xff] }
  0x61   :  { %928 = vmatpush.msra.mxu1 %v3479_v31  ;;  %1038 = vmatpush.msra.mxu3 %v3496_v43  ;;  %v5586_v31 = vand.u32 4294901760, %v3564_v1 }
  0x62   :  { %688 = vmatmul.f32.vlgmr.msrb.gmra.mxu0 %v3676_v20  ;;  %983 = vmatpush.msra.mxu2 %v5585_v7 }
  0x63   :  { %930 = vmatpush.msra.mxu1 %v3496_v43  ;;  %885 = vmatpush.msra.mxu0 %v3556_v26  ;;  %v5587_v26 = vand.u32 4294901760, %v3579_v38  ;;  %v382_v43 = vld [vmem:[#allocation2 + $0x3d0] sm:$0xff] }
  0x64   :  { %1040 = vmatpush.msra.mxu3 %v3511_v57  ;;  %725 = vmatmul.f32.vlgmr.msrb.gmra.mxu1 %v3676_v20 }
  0x65   :  { %888 = vmatpush.msra.mxu0 %v3564_v1  ;;  %932 = vmatpush.msra.mxu1 %v3511_v57  ;;  %v5588_v57 = vand.u32 4294901760, %v3596_v48  ;;  %v374_v1 = vld [vmem:[#allocation2 + $0x390] sm:$0xff] }
  0x66   :  { %987 = vmatpush.msra.mxu2 %v5586_v31  ;;  %1042 = vmatpush.msra.mxu3 %v3527_v2 }
  0x67   :  { %891 = vmatpush.msra.mxu0 %v3579_v38  ;;  %934 = vmatpush.msra.mxu1 %v3527_v2  ;;  %v3806_v2 = vand.u32 4294901760, %v382_v43 }
  0x68   :  { %991 = vmatpush.msra.mxu2 %v5587_v26  ;;  %1044 = vmatpush.msra.mxu3 %v3532_v6  ;;  %v3949_v26 = vand.u32 4294901760, %v286_v59 }
  0x69   :  { %894 = vmatpush.msra.mxu0 %v3596_v48  ;;  %936 = vmatpush.msra.mxu1 %v3532_v6  ;;  %v3815_v6 = vand.u32 4294901760, %v374_v1  ;;  %v3821_v38 = vsub.f32 %v382_v43, %v3806_v2  ;;  %v350_v48 = vld [vmem:[#allocation2 + $0x2d0] sm:$0xff] }
  0x6a   :  { %995 = vmatpush.msra.mxu2 %v5588_v57  ;;  %1046 = vmatpush.msra.mxu3 %v3548_v53 }
  0x6b   :  { %897 = vmatpush.msra.mxu0 %v3608_v33  ;;  %938 = vmatpush.msra.mxu1 %v3548_v53  ;;  %v366_v53 = vld [vmem:[#allocation2 + $0x350] sm:$0xff]  ;;  %v3833_v33 = vsub.f32 %v374_v1, %v3815_v6  ;;  %v5458_v1 = vand.u32 4294901760, %v3935_v62 }
  0x6c   :  { %999 = vmatpush.msra.mxu2 %v820_v56  ;;  %1048 = vmatpush.msra.mxu3 %v3571_v23  ;;  %v3843_v56 = vand.u32 4294901760, %v350_v48 }
  0x6d   :  { %900 = vmatpush.msra.mxu0 %v3620_v60  ;;  %940 = vmatpush.msra.mxu1 %v3571_v23  ;;  %v358_v23 = vld [vmem:[#allocation2 + $0x310] sm:$0xff] }
  0x6e   :  { %1003 = vmatpush.msra.mxu2 %v826_v37  ;;  %1050 = vmatpush.msra.mxu3 %v3586_v24  ;;  %v3839_v60 = vand.u32 4294901760, %v358_v23  ;;  %v5471_v37 = vand.u32 4294901760, %v3833_v33 }
  0x6f   :  { %903 = vmatpush.msra.mxu0 %v3632_v13  ;;  %942 = vmatpush.msra.mxu1 %v3586_v24  ;;  %v3828_v24 = vand.u32 4294901760, %v366_v53  ;;  %v342_v13 = vld [vmem:[#allocation2 + $0x290] sm:$0xff] }
  0x70   :  { %1007 = vmatpush.msra.mxu2 %v832_v34  ;;  %1052 = vmatpush.msra.mxu3 %v3598_v29  ;;  %v3861_v34 = vsub.f32 %v358_v23, %v3839_v60  ;;  %v3961_v23 = vand.u32 4294901760, %v278_v19 }
  0x71   :  { %906 = vmatpush.msra.mxu0 %v3645_v44  ;;  %944 = vmatpush.msra.mxu1 %v3598_v29  ;;  %v5472_v29 = vand.u32 4294901760, %v3821_v38  ;;  %v334_v44 = vld [vmem:[#allocation2 + $0x250] sm:$0xff] }
  0x72   :  { %1011 = vmatpush.msra.mxu2 %v838_v27  ;;  %1054 = vmatpush.msra.mxu3 %v3610_v51  ;;  %v326_v27 = vld [vmem:[#allocation2 + $0x210] sm:$0xff]  ;;  %v5466_v42 = vand.u32 4294901760, %v3861_v34 }
  0x73   :  { %909 = vmatpush.msra.mxu0 %v3658_v36  ;;  %946 = vmatpush.msra.mxu1 %v3610_v51  ;;  %v3849_v51 = vsub.f32 %v366_v53, %v3828_v24  ;;  %v3863_v36 = vand.u32 4294901760, %v342_v13  ;;  %v3959_v53 = vsub.f32 %v294_v61, %v3937_v39 }
  0x74   :  { %1015 = vmatpush.msra.mxu2 %v844_v4  ;;  %1056 = vmatpush.msra.mxu3 %v3622_v63  ;;  %v3874_v4 = vand.u32 4294901760, %v334_v44  ;;  %v1132_v28 = vsub.f32 %v3861_v34, %v5466_v42 }
  0x75   :  { %912 = vmatpush.msra.mxu0 %v3671_v40  ;;  %948 = vmatpush.msra.mxu1 %v3622_v63  ;;  %v1114_v63 = vsub.f32 %v3821_v38, %v5472_v29  ;;  %v5467_v40 = vand.u32 4294901760, %v3849_v51  ;;  %v3887_v54 = vsub.f32 %v342_v13, %v3863_v36  ;;  %v383_v13 = vld [vmem:[#allocation2 + $0x3d8] sm:$0xff] }
  0x76   :  { %1019 = vmatpush.msra.mxu2 %v850_v22  ;;  %1058 = vmatpush.msra.mxu3 %v3634_v55  ;;  %v3881_v22 = vand.u32 4294901760, %v326_v27  ;;  %v3898_v9 = vsub.f32 %v334_v44, %v3874_v4  ;;  %v1133_v49 = vand.u32 4294901760, %v1132_v28  ;;  %v3985_v28 = vand.u32 4294901760, %v383_v13 }
  0x77   :  { %915 = vmatpush.msra.mxu0 %v3684_v0  ;;  %950 = vmatpush.msra.mxu1 %v3634_v55  ;;  %v3868_v55 = vsub.f32 %v350_v48, %v3843_v56  ;;  %v1120_v0 = vsub.f32 %v3833_v33, %v5471_v37  ;;  %v1126_v52 = vsub.f32 %v3849_v51, %v5467_v40  ;;  %v5464_v18 = vand.u32 4294901760, %v3887_v54  ;;  %v270_v48 = vld [vmem:[#allocation2 + $0x50] sm:$0xff]  ;;  %v327_v40 = vld [vmem:[#allocation2 + $0x218] sm:$0xff] }
  0x78   :  { %1023 = vmatpush.msra.mxu2 %v856_v14  ;;  %1060 = vmatpush.msra.mxu3 %v3647_v21  ;;  %v318_v14 = vld [vmem:[#allocation2 + $0x1d0] sm:$0xff]  ;;  %v3905_v25 = vsub.f32 %v326_v27, %v3881_v22  ;;  %v5462_v30 = vand.u32 4294901760, %v3898_v9  ;;  %v3975_v50 = vand.u32 4294901760, %v270_v48  ;;  %v4080_v29 = vand.u32 4294901760, %v327_v40 }
  0x79   :  { %766 = vmatmul.f32.vlgmr.msrb.gmra.mxu2 %v3748_v12  ;;  %918 = vmatpush.msra.mxu0 %v3715_v15  ;;  %v5465_v15 = vand.u32 4294901760, %v3868_v55  ;;  %v3900_v3 = vand.u32 4294901760, %v318_v14  ;;  %v1127_v45 = vand.u32 4294901760, %v1126_v52  ;;  %v1144_v8 = vsub.f32 %v3887_v54, %v5464_v18 }
  0x7a   :  { %952 = vmatpush.msra.mxu1 %v3647_v21  ;;  %1027 = vmatpush.msra.mxu2 %v862_v58  ;;  %v1115_v21 = vand.u32 4294901760, %v1114_v63  ;;  %v302_v58 = vld [vmem:[#allocation2 + $0x150] sm:$0xff]  ;;  %v5461_v47 = vand.u32 4294901760, %v3905_v25  ;;  %v1150_v11 = vsub.f32 %v3898_v9, %v5462_v30  ;;  %5589 = vst [vmem:[#allocation15_spill] sm:$0xff] %v3975_v50  ;;  %v1168_v52 = vsub.f32 %v3935_v62, %v5458_v1 }
  0x7b   :  { %1062 = vmatpush.msra.mxu3 %v3660_v16  ;;  %1071 = vmatpush.msrb.mxu0 %v3806_v2  ;;  %v3923_v46 = vsub.f32 %v318_v14, %v3900_v3  ;;  %v3925_v35 = vand.u32 4294901760, %v302_v58  ;;  %v1145_v57 = vand.u32 4294901760, %v1144_v8  ;;  %v262_v14 = vld [vmem:[#allocation2 + $0x10] sm:$0xff]  ;;  %v367_v8 = vld [vmem:[#allocation2 + $0x358] sm:$0xff] }
  0x7c   :  { %867 = vmatmul.f32.vlgmr.msrb.gmra.mxu3 %v3676_v20  ;;  %1214 = vmatpush.msrb.mxu2 %v3821_v38  ;;  %v1156_v43 = vsub.f32 %v3905_v25, %v5461_v47  ;;  %v1151_v44 = vand.u32 4294901760, %v1150_v11  ;;  %v3989_v61 = vand.u32 4294901760, %v262_v14  ;;  %v1169_v11 = vand.u32 4294901760, %v1168_v52 }
  0x7d   :  { %954 = vmatpush.msra.mxu1 %v3660_v16  ;;  %1064 = vmatpush.msra.mxu3 %v3694_v5  ;;  %v1121_v16 = vand.u32 4294901760, %v1120_v0  ;;  %v5459_v7 = vand.u32 4294901760, %v3923_v46  ;;  %v3947_v31 = vsub.f32 %v302_v58, %v3925_v35  ;;  %v3971_v0 = vsub.f32 %v286_v59, %v3949_v26 }
  0x7e   :  { %1073 = vmatpush.msrb.mxu0 %v3815_v6  ;;  %1217 = vmatpush.msrb.mxu2 %v3833_v33  ;;  %v3983_v58 = vsub.f32 %v278_v19, %v3961_v23 }
  0x7f   :  { %1267 = vmatpush.msrb.mxu3 %v3806_v2  ;;  %956 = vmatpush.msra.mxu1 %v3694_v5  ;;  %v1138_v5 = vsub.f32 %v3868_v55, %v5465_v15  ;;  %v1162_v63 = vsub.f32 %v3923_v46, %v5459_v7  ;;  %v5456_v27 = vand.u32 4294901760, %v3947_v31  ;;  %v343_v7 = vld [vmem:[#allocation2 + $0x298] sm:$0xff] }
  0x80   :  { %1075 = vmatpush.msrb.mxu0 %v3828_v24  ;;  %1220 = vmatpush.msrb.mxu2 %v3849_v51 }
  0x81   :  { %1116 = vmatpush.msrb.mxu1 %v1115_v21  ;;  %1269 = vmatpush.msrb.mxu3 %v3815_v6  ;;  %v1139_v41 = vand.u32 4294901760, %v1138_v5  ;;  %v1157_v21 = vand.u32 4294901760, %v1156_v43  ;;  %v375_v5 = vld [vmem:[#allocation2 + $0x398] sm:$0xff]  ;;  %v1174_v59 = vsub.f32 %v3947_v31, %v5456_v27  ;;  %v4016_v27 = vand.u32 4294901760, %v367_v8 }
  0x82   :  { %1029 = vmatmul.f32.vlgmr.msra.gmra.mxu2 %v3676_v20  ;;  %1077 = vmatpush.msrb.mxu0 %v3839_v60  ;;  %v4001_v19 = vand.u32 4294901760, %v375_v5 }
  0x83   :  { %1122 = vmatpush.msrb.mxu1 %v1121_v16  ;;  %1223 = vmatpush.msrb.mxu2 %v3861_v34  ;;  %v5457_v16 = vand.u32 4294901760, %v3959_v53  ;;  %v1175_v52 = vand.u32 4294901760, %v1174_v59  ;;  %v4041_v30 = vsub.f32 %v367_v8, %v4016_v27 }
  0x84   :  { %1271 = vmatpush.msrb.mxu3 %v3828_v24  ;;  %921 = vmatmul.f32.vlgmr.msra.gmra.mxu0 %v3700_v10 }
  0x85   :  { %1066 = vmatmul.f32.vlgmr.msra.gmra.mxu3 %v3676_v20  ;;  %1079 = vmatpush.msrb.mxu0 %v3843_v56  ;;  %v1180_v43 = vsub.f32 %v3959_v53, %v5457_v16  ;;  %5591 = vst [vmem:[#allocation16_spill] sm:$0xff] %v4041_v30  ;;  %v5594_v20 = vand.u32 4294901760, %v4041_v30 }
  0x86   :  { %1128 = vmatpush.msrb.mxu1 %v1127_v45  ;;  %1226 = vmatpush.msrb.mxu2 %v3868_v55  ;;  %v1163_v45 = vand.u32 4294901760, %v1162_v63  ;;  %v359_v63 = vld [vmem:[#allocation2 + $0x318] sm:$0xff] }
  0x87   :  { %1273 = vmatpush.msrb.mxu3 %v3839_v60  ;;  %960 = vmatmul.f32.vlgmr.msra.gmra.mxu1 %v3721_v17  ;;  %v4028_v1 = vand.u32 4294901760, %v359_v63 }
  0x88   :  { %1081 = vmatpush.msrb.mxu0 %v3863_v36  ;;  %1134 = vmatpush.msrb.mxu1 %v1133_v49  ;;  %v5460_v49 = vand.u32 4294901760, %v3971_v0 }
  0x89   :  { %1229 = vmatpush.msrb.mxu2 %v3887_v54  ;;  %1275 = vmatpush.msrb.mxu3 %v3843_v56  ;;  %v4053_v8 = vsub.f32 %v359_v63, %v4028_v1 }
  0x8a   :  { %1083 = vmatpush.msrb.mxu0 %v3874_v4  ;;  %1140 = vmatpush.msrb.mxu1 %v1139_v41  ;;  %v3999_v41 = vsub.f32 %v270_v48, %v3975_v50  ;;  %v4014_v48 = vsub.f32 %v262_v14, %v3989_v61  ;;  %v4026_v14 = vsub.f32 %v375_v5, %v4001_v19 }
  0x8b   :  { %1232 = vmatpush.msrb.mxu2 %v3898_v9  ;;  %1277 = vmatpush.msrb.mxu3 %v3863_v36  ;;  %5592 = vst [vmem:[#allocation18_spill] sm:$0xff] %v4053_v8 }
  0x8c   :  { %1085 = vmatpush.msrb.mxu0 %v3881_v22  ;;  %1146 = vmatpush.msrb.mxu1 %v1145_v57  ;;  %v5463_v57 = vand.u32 4294901760, %v3983_v58  ;;  %v5468_v16 = vand.u32 4294901760, %v3999_v41  ;;  %5590 = vst [vmem:[#allocation17_spill] sm:$0xff] %v4026_v14  ;;  %v5470_v5 = vand.u32 4294901760, %v4014_v48  ;;  %v5475_v15 = vand.u32 4294901760, %v4026_v14 }
  0x8d   :  { %1235 = vmatpush.msrb.mxu2 %v3905_v25  ;;  %1279 = vmatpush.msrb.mxu3 %v3874_v4 }
  0x8e   :  { %1087 = vmatpush.msrb.mxu0 %v3900_v3  ;;  %1152 = vmatpush.msrb.mxu1 %v1151_v44  ;;  %v4009_v44 = vsub.f32 %v383_v13, %v3985_v28  ;;  %v1186_v13 = vsub.f32 %v3971_v0, %v5460_v49  ;;  %v1192_v59 = vsub.f32 %v3983_v58, %v5463_v57  ;;  %v335_v57 = vld [vmem:[#allocation2 + $0x258] sm:$0xff] }
  0x8f   :  { %1238 = vmatpush.msrb.mxu2 %v3923_v46  ;;  %1281 = vmatpush.msrb.mxu3 %v3881_v22  ;;  %v1198_v18 = vsub.f32 %v3999_v41, %v5468_v16  ;;  %v1204_v63 = vsub.f32 %v4014_v48, %v5470_v5  ;;  %v1461_v5 = vsub.f32 %v4026_v14, %v5475_v15  ;;  %v311_v16 = vld [vmem:[#allocation2 + $0x198] sm:$0xff] }
  0x90   :  { %1089 = vmatpush.msrb.mxu0 %v3912_v32  ;;  %1158 = vmatpush.msrb.mxu1 %v1157_v21  ;;  %v351_v21 = vld [vmem:[#allocation2 + $0x2d8] sm:$0xff]  ;;  %v5469_v49 = vand.u32 4294901760, %v4009_v44  ;;  %v1467_v15 = vsub.f32 %v4041_v30, %v5594_v20  ;;  %v4105_v30 = vand.u32 4294901760, %v311_v16 }
  0x91   :  { %1241 = vmatpush.msrb.mxu2 %v3935_v62  ;;  %1283 = vmatpush.msrb.mxu3 %v3900_v3  ;;  %v4035_v47 = vand.u32 4294901760, %v351_v21 }
  0x92   :  { %1091 = vmatpush.msrb.mxu0 %v3925_v35  ;;  %1164 = vmatpush.msrb.mxu1 %v1163_v45  ;;  %v1181_v45 = vand.u32 4294901760, %v1180_v43  ;;  %v4044_v43 = vand.u32 4294901760, %v343_v7 }
  0x93   :  { %1244 = vmatpush.msrb.mxu2 %v3947_v31  ;;  %1285 = vmatpush.msrb.mxu3 %v3912_v32  ;;  %v4060_v42 = vsub.f32 %v351_v21, %v4035_v47  ;;  %v319_v21 = vld [vmem:[#allocation2 + $0x1d8] sm:$0xff] }
  0x94   :  { %1093 = vmatpush.msrb.mxu0 %v3937_v39  ;;  %1170 = vmatpush.msrb.mxu1 %v1169_v11  ;;  %v1187_v11 = vand.u32 4294901760, %v1186_v13  ;;  %v1455_v13 = vsub.f32 %v4009_v44, %v5469_v49  ;;  %v1199_v49 = vand.u32 4294901760, %v1198_v18  ;;  %v1205_v18 = vand.u32 4294901760, %v1204_v63 }
  0x95   :  { %1247 = vmatpush.msrb.mxu2 %v3959_v53  ;;  %1287 = vmatpush.msrb.mxu3 %v3925_v35  ;;  %5593 = vst [vmem:[#allocation19_spill] sm:$0xff] %v4060_v42  ;;  %v4092_v14 = vand.u32 4294901760, %v319_v21  ;;  %v1462_v63 = vand.u32 4294901760, %v1461_v5  ;;  %v1468_v5 = vand.u32 4294901760, %v1467_v15 }
  0x96   :  { %1095 = vmatpush.msrb.mxu0 %v3949_v26  ;;  %1176 = vmatpush.msrb.mxu1 %v1175_v52  ;;  %v1193_v52 = vand.u32 4294901760, %v1192_v59  ;;  %v4072_v59 = vsub.f32 %v343_v7, %v4044_v43  ;;  %v303_v7 = vld [vmem:[#allocation2 + $0x158] sm:$0xff] }
  0x97   :  { %1250 = vmatpush.msrb.mxu2 %v3971_v0  ;;  %1289 = vmatpush.msrb.mxu3 %v3937_v39 }
  0x98   :  { %1097 = vmatpush.msrb.mxu0 %v3961_v23  ;;  %1182 = vmatpush.msrb.mxu1 %v1181_v45  ;;  %v4068_v45 = vand.u32 4294901760, %v335_v57 }
  0x99   :  { %1253 = vmatpush.msrb.mxu2 %v3983_v58  ;;  %1291 = vmatpush.msrb.mxu3 %v3949_v26 }
  0x9a   :  { %1099 = vmatpush.msrb.mxu0 %v3975_v50  ;;  %1188 = vmatpush.msrb.mxu1 %v1187_v11  ;;  %v1456_v11 = vand.u32 4294901760, %v1455_v13  ;;  %v4090_v37 = vsub.f32 %v335_v57, %v4068_v45  ;;  %v4103_v57 = vsub.f32 %v327_v40, %v4080_v29  ;;  %v295_v13 = vld [vmem:[#allocation2 + $0x118] sm:$0xff]  ;;  %v4115_v40 = vsub.f32 %v319_v21, %v4092_v14 }
  0x9b   :  { %1256 = vmatpush.msrb.mxu2 %v3999_v41  ;;  %1293 = vmatpush.msrb.mxu3 %v3961_v23  ;;  %v4128_v21 = vsub.f32 %v311_v16, %v4105_v30 }
  0x9c   :  { %1101 = vmatpush.msrb.mxu0 %v3989_v61  ;;  %1194 = vmatpush.msrb.mxu1 %v1193_v52  ;;  %v5595_v52 = vand.u32 4294901760, %v3821_v38  ;;  %v5597_v38 = vand.u32 4294901760, %v3833_v33  ;;  %v5599_v33 = vand.u32 4294901760, %v3849_v51  ;;  %v5601_v51 = vand.u32 4294901760, %v3861_v34 }
  0x9d   :  { %1259 = vmatpush.msrb.mxu2 %v4014_v48  ;;  %1295 = vmatpush.msrb.mxu3 %v3975_v50  ;;  %v5596_v50 = vand.u32 4294901760, %v4053_v8  ;;  %v5602_v34 = vand.u32 4294901760, %v3868_v55  ;;  %v5603_v55 = vand.u32 4294901760, %v3887_v54 }
  0x9e   :  { %1308 = vmatpush.msra.mxu0 %v5595_v52  ;;  %1200 = vmatpush.msrb.mxu1 %v1199_v49  ;;  %v5598_v52 = vand.u32 4294901760, %v4060_v42 }
  0x9f   :  { %1412 = vmatpush.msra.mxu2 %v3985_v28  ;;  %1297 = vmatpush.msrb.mxu3 %v3989_v61  ;;  %v1473_v20 = vsub.f32 %v4053_v8, %v5596_v50  ;;  %v5485_v50 = vand.u32 4294901760, %v4090_v37  ;;  %v4117_v8 = vand.u32 4294901760, %v303_v7 }
  0xa0   :  { %1312 = vmatpush.msra.mxu0 %v5597_v38  ;;  %v1479_v49 = vsub.f32 %v4060_v42, %v5598_v52  ;;  %1206 = vmatpush.msrb.mxu1 %v1205_v18  ;;  %v5600_v38 = vand.u32 4294901760, %v4072_v59  ;;  %v287_v42 = vld [vmem:[#allocation2 + $0xd8] sm:$0xff]  ;;  %v4130_v18 = vand.u32 4294901760, %v295_v13 }
  0xa1   :  { %1414 = vmatpush.msra.mxu2 %v4001_v19  ;;  %1457 = vmatpush.msra.mxu3 %v1456_v11  ;;  %v1474_v15 = vand.u32 4294901760, %v1473_v20  ;;  %v1496_v11 = vand.u32 4294901760, %v4103_v57  ;;  %v1502_v20 = vand.u32 4294901760, %v4115_v40  ;;  %v4141_v16 = vsub.f32 %v303_v7, %v4117_v8 }
  0xa2   :  { %1316 = vmatpush.msra.mxu0 %v5599_v33  ;;  %1375 = vmatpush.msra.mxu1 %v3806_v2  ;;  %v1485_v52 = vsub.f32 %v4072_v59, %v5600_v38  ;;  %v1480_v2 = vand.u32 4294901760, %v1479_v49  ;;  %v279_v33 = vld [vmem:[#allocation2 + $0x98] sm:$0xff]  ;;  %v4143_v38 = vand.u32 4294901760, %v287_v42  ;;  %v4154_v7 = vsub.f32 %v295_v13, %v4130_v18 }
  0xa3   :  { %1416 = vmatpush.msra.mxu2 %v4016_v27  ;;  %1463 = vmatpush.msra.mxu3 %v1462_v63  ;;  %v1491_v63 = vsub.f32 %v4090_v37, %v5485_v50  ;;  %v1497_v49 = vsub.f32 %v4103_v57, %v1496_v11  ;;  %v271_v50 = vld [vmem:[#allocation2 + $0x58] sm:$0xff] }
  0xa4   :  { %1320 = vmatpush.msra.mxu0 %v5601_v51  ;;  %1377 = vmatpush.msra.mxu1 %v3815_v6  ;;  %v1486_v6 = vand.u32 4294901760, %v1485_v52  ;;  %v4156_v51 = vand.u32 4294901760, %v279_v33  ;;  %v1503_v52 = vsub.f32 %v4115_v40, %v1502_v20  ;;  %v4167_v13 = vsub.f32 %v287_v42, %v4143_v38 }
  0xa5   :  { %1418 = vmatpush.msra.mxu2 %v4028_v1  ;;  %1469 = vmatpush.msra.mxu3 %v1468_v5  ;;  %v1508_v5 = vand.u32 4294901760, %v4128_v21  ;;  %v4172_v54 = vand.u32 4294901760, %v271_v50 }
  0xa6   :  { %1324 = vmatpush.msra.mxu0 %v5602_v34  ;;  %1379 = vmatpush.msra.mxu1 %v3828_v24  ;;  %v1492_v24 = vand.u32 4294901760, %v1491_v63  ;;  %v5604_v34 = vand.u32 4294901760, %v3898_v9  ;;  %v4180_v42 = vsub.f32 %v279_v33, %v4156_v51  ;;  %v5605_v9 = vand.u32 4294901760, %v3905_v25 }
  0xa7   :  { %1420 = vmatpush.msra.mxu2 %v4035_v47  ;;  %1475 = vmatpush.msra.mxu3 %v1474_v15  ;;  %v1514_v15 = vand.u32 4294901760, %v4141_v16  ;;  %v1509_v63 = vsub.f32 %v4128_v21, %v1508_v5  ;;  %v5606_v33 = vand.u32 4294901760, %v3923_v46  ;;  %v4196_v25 = vsub.f32 %v271_v50, %v4172_v54 }
  0xa8   :  { %1328 = vmatpush.msra.mxu0 %v5603_v55  ;;  %1381 = vmatpush.msra.mxu1 %v3839_v60  ;;  %v263_v60 = vld [vmem:[#allocation2 + $0x18] sm:$0xff]  ;;  %v1520_v55 = vand.u32 4294901760, %v4154_v7 }
  0xa9   :  { %1422 = vmatpush.msra.mxu2 %v4044_v43  ;;  %1481 = vmatpush.msra.mxu3 %v1480_v2  ;;  %v1498_v2 = vand.u32 4294901760, %v1497_v49  ;;  %v1526_v49 = vand.u32 4294901760, %v4167_v13 }
  0xaa   :  { %1332 = vmatpush.msra.mxu0 %v5604_v34  ;;  %1383 = vmatpush.msra.mxu1 %v3843_v56  ;;  %v1504_v56 = vand.u32 4294901760, %v1503_v52  ;;  %v4190_v34 = vand.u32 4294901760, %v263_v60  ;;  %v1532_v52 = vand.u32 4294901760, %v4180_v42 }
  0xab   :  { %1424 = vmatpush.msra.mxu2 %v4068_v45  ;;  %1487 = vmatpush.msra.mxu3 %v1486_v6  ;;  %v1515_v6 = vsub.f32 %v4141_v16, %v1514_v15  ;;  %v1527_v46 = vsub.f32 %v4167_v13, %v1526_v49 }
  0xac   :  { %1336 = vmatpush.msra.mxu0 %v5605_v9  ;;  %1385 = vmatpush.msra.mxu1 %v3863_v36  ;;  %v1510_v36 = vand.u32 4294901760, %v1509_v63  ;;  %v5607_v9 = vand.u32 4294901760, %v3935_v62  ;;  %v4211_v50 = vsub.f32 %v263_v60, %v4190_v34  ;;  %v1538_v62 = vand.u32 4294901760, %v4196_v25 }
  0xad   :  { %1426 = vmatpush.msra.mxu2 %v4080_v29  ;;  %1493 = vmatpush.msra.mxu3 %v1492_v24  ;;  %v1521_v24 = vsub.f32 %v4154_v7, %v1520_v55  ;;  %v1533_v63 = vsub.f32 %v4180_v42, %v1532_v52  ;;  %v5610_v60 = vand.u32 4294901760, %v3971_v0  ;;  %v5612_v0 = vand.u32 4294901760, %v3999_v41 }
  0xae   :  { %1340 = vmatpush.msra.mxu0 %v5606_v33  ;;  %1387 = vmatpush.msra.mxu1 %v3874_v4  ;;  %v1516_v4 = vand.u32 4294901760, %v1515_v6  ;;  %v1539_v6 = vsub.f32 %v4196_v25, %v1538_v62 }
  0xaf   :  { %1428 = vmatpush.msra.mxu2 %v4092_v14  ;;  %1499 = vmatpush.msra.mxu3 %v1498_v2  ;;  %v5608_v2 = vand.u32 4294901760, %v3947_v31  ;;  %v1528_v31 = vand.u32 4294901760, %v1527_v46  ;;  %v5617_v46 = vld [vmem:[#allocation17_spill] sm:$0xff] }
  0xb0   :  { %1344 = vmatpush.msra.mxu0 %v5607_v9  ;;  %1389 = vmatpush.msra.mxu1 %v3881_v22  ;;  %v1522_v22 = vand.u32 4294901760, %v1521_v24  ;;  %v1540_v33 = vand.u32 4294901760, %v1539_v6  ;;  %v5614_v9 = vand.u32 4294901760, %v4009_v44  ;;  %v5626_v6 = vand.u32 4294901760, %v4090_v37 }
  0xb1   :  { %1430 = vmatpush.msra.mxu2 %v4105_v30  ;;  %1505 = vmatpush.msra.mxu3 %v1504_v56  ;;  %v5609_v56 = vand.u32 4294901760, %v3959_v53  ;;  %v1534_v53 = vand.u32 4294901760, %v1533_v63 }
  0xb2   :  { %1348 = vmatpush.msra.mxu0 %v5608_v2  ;;  %1391 = vmatpush.msra.mxu1 %v3900_v3  ;;  %v1544_v3 = vand.u32 4294901760, %v4211_v50  ;;  %v5618_v2 = vand.u32 4294901760, %v5617_v46 }
  0xb3   :  { %1432 = vmatpush.msra.mxu2 %v4117_v8  ;;  %1511 = vmatpush.msra.mxu3 %v1510_v36  ;;  %v83_v36 = vld [vmem:[#allocation8] sm:$0xff] }
  0xb4   :  { %1352 = vmatpush.msra.mxu0 %v5609_v56  ;;  %1393 = vmatpush.msra.mxu1 %v3912_v32  ;;  %v5611_v32 = vand.u32 4294901760, %v3983_v58  ;;  %v75_v58 = vld [vmem:[#allocation7] sm:$0xff]  ;;  %v5621_v56 = vld [vmem:[#allocation18_spill] sm:$0xff] }
  0xb5   :  { %1434 = vmatpush.msra.mxu2 %v4130_v18  ;;  %1517 = vmatpush.msra.mxu3 %v1516_v4  ;;  %v91_v24 = vsub.f32 %v75_v58, %v83_v36  ;;  %v5616_v4 = vld [vmem:[#allocation20_spill] sm:$0xff] }
  0xb6   :  { %1356 = vmatpush.msra.mxu0 %v5610_v60  ;;  %1395 = vmatpush.msra.mxu1 %v3925_v35  ;;  %v1545_v35 = vsub.f32 %v4211_v50, %v1544_v3  ;;  %v5625_v60 = vand.u32 4294901760, %v4072_v59 }
  0xb7   :  { %1436 = vmatpush.msra.mxu2 %v4143_v38  ;;  %1523 = vmatpush.msra.mxu3 %v1522_v22  ;;  %v5619_v22 = vld [vmem:[#allocation16_spill] sm:$0xff] }
  0xb8   :  { %1360 = vmatpush.msra.mxu0 %v5611_v32  ;;  %1397 = vmatpush.msra.mxu1 %v3937_v39  ;;  %v5613_v39 = vand.u32 4294901760, %v4014_v48  ;;  %v1546_v41 = vand.u32 4294901760, %v1545_v35  ;;  %v5615_v48 = vld [vmem:[#allocation15_spill] sm:$0xff] }
  0xb9   :  { %1438 = vmatpush.msra.mxu2 %v4156_v51  ;;  %1529 = vmatpush.msra.mxu3 %v1528_v31  ;;  %v5622_v31 = vand.u32 4294901760, %v5621_v56 }
  0xba   :  { %1364 = vmatpush.msra.mxu0 %v5612_v0  ;;  %1399 = vmatpush.msra.mxu1 %v3949_v26  ;;  %v4250_v26 = vand.u32 2147483647, %v91_v24  ;;  %v352_v0 = vld [vmem:[#allocation2 + $0x2e0] sm:$0xff] }
  0xbb   :  { %1440 = vmatpush.msra.mxu2 %v4172_v54  ;;  %1535 = vmatpush.msra.mxu3 %v1534_v53  ;;  %v344_v24 = vld [vmem:[#allocation2 + $0x2a0] sm:$0xff] }
  0xbc   :  { %1262 = vmatmul.f32.vlgmr.msrb.gmra.mxu2 %v3700_v10  ;;  %1368 = vmatpush.msra.mxu0 %v5613_v39  ;;  %vm243_vm1 = vcmp.lt.f32.partialorder %v4250_v26, 1.0 }
  0xbd   :  { %1401 = vmatpush.msra.mxu1 %v3961_v23  ;;  %1442 = vmatpush.msra.mxu2 %v4190_v34  ;;  %v107_v23 = vmul.f32 19.085537, %v4250_v26 }
  0xbe   :  { %1541 = vmatpush.msra.mxu3 %v1540_v33  ;;  %1107 = vmatmul.f32.vlgmr.msrb.gmra.mxu0 %v3748_v12 }
  0xbf   :  { %1301 = vmatmul.f32.vlgmr.msrb.gmra.mxu3 %v3721_v17  ;;  %1555 = vmatpush.msrb.mxu0 %v4009_v44  ;;  %v5620_v44 = vand.u32 4294901760, %v5619_v22  ;;  %v115_v63 = vadd.f32 1.0, %v107_v23 }
  0xc0   :  { %1649 = vmatpush.msrb.mxu2 %v5614_v9  ;;  %1403 = vmatpush.msra.mxu1 %v5615_v48  ;;  %v336_v9 = vld [vmem:[#allocation2 + $0x260] sm:$0xff] }
  0xc1   :  { %1547 = vmatpush.msra.mxu3 %v1546_v41  ;;  %1208 = vmatmul.f32.vlgmr.msrb.gmra.mxu1 %v5616_v4  ;;  %3158 = vlog2.f32 %v115_v63 }
  0xc2   :  { %1558 = vmatpush.msrb.mxu0 %v5617_v46  ;;  %1653 = vmatpush.msrb.mxu2 %v5618_v2  ;;  %v4366_v46 = vand.u32 4294901760, %v344_v24 }
  0xc3   :  { %1716 = vmatpush.msrb.mxu3 %v3985_v28  ;;  %1405 = vmatpush.msra.mxu1 %v3989_v61 }
  0xc4   :  { %1561 = vmatpush.msrb.mxu0 %v5619_v22  ;;  %1657 = vmatpush.msrb.mxu2 %v5620_v44  ;;  %v4374_v22 = vand.u32 4294901760, %v336_v9  ;;  %v84_v44 = vld [vmem:[#allocation8 + $0x8] sm:$0xff] }
  0xc5   :  { %1608 = vmatpush.msrb.mxu1 %v3985_v28  ;;  %1718 = vmatpush.msrb.mxu3 %v4001_v19  ;;  %v5623_v28 = vld [vmem:[#allocation19_spill] sm:$0xff] }
  0xc6   :  { %1564 = vmatpush.msrb.mxu0 %v5621_v56  ;;  %1661 = vmatpush.msrb.mxu2 %v5622_v31  ;;  %v5624_v61 = vand.u32 4294901760, %v5623_v28  ;;  %v320_v31 = vld [vmem:[#allocation2 + $0x1e0] sm:$0xff] }
  0xc7   :  { %1610 = vmatpush.msrb.mxu1 %v4001_v19  ;;  %1720 = vmatpush.msrb.mxu3 %v4016_v27  ;;  %v134_v19 = vmul.f32 -0.5, %v107_v23  ;;  %v3159_v32 = vpop.eup %3158 }
  0xc8   :  { %1370 = vmatmul.f32.vlgmr.msra.gmra.mxu0 %v5616_v4  ;;  %1665 = vmatpush.msrb.mxu2 %v5624_v61 }
  0xc9   :  { %1612 = vmatpush.msrb.mxu1 %v4016_v27  ;;  %1567 = vmatpush.msrb.mxu0 %v5623_v28  ;;  %v384_v27 = vld [vmem:[#allocation2 + $0x3e0] sm:$0xff]  ;;  %v135_v53 = vadd.f32 1.0, %v134_v19 }
  0xca   :  { %1722 = vmatpush.msrb.mxu3 %v4028_v1  ;;  %1407 = vmatmul.f32.vlgmr.msra.gmra.mxu1 %v5616_v4 }
  0xcb   :  { %1570 = vmatpush.msrb.mxu0 %v4072_v59  ;;  %1614 = vmatpush.msrb.mxu1 %v4028_v1  ;;  %v137_v1 = vand.u32 2147483647, %v107_v23  ;;  %v4296_v59 = vand.u32 4294901760, %v384_v27 }
  0xcc   :  { %1669 = vmatpush.msrb.mxu2 %v5625_v60  ;;  %1724 = vmatpush.msrb.mxu3 %v4035_v47 }
  0xcd   :  { %1573 = vmatpush.msrb.mxu0 %v4090_v37  ;;  %1616 = vmatpush.msrb.mxu1 %v4035_v47  ;;  %v376_v37 = vld [vmem:[#allocation2 + $0x3a0] sm:$0xff]  ;;  %v133_v47 = vmul.f32 0.6931472, %v3159_v32  ;;  %vm4305_vm0 = vcmp.lt.f32.partialorder %v137_v1, 0.0004427343  ;;  %v4401_v32 = vand.u32 4294901760, %v320_v31 }
  0xce   :  { %1673 = vmatpush.msrb.mxu2 %v5626_v6  ;;  %1726 = vmatpush.msrb.mxu3 %v4044_v43  ;;  %v312_v1 = vld [vmem:[#allocation2 + $0x1a0] sm:$0xff] }
  0xcf   :  { %1576 = vmatpush.msrb.mxu0 %v4103_v57  ;;  %1618 = vmatpush.msrb.mxu1 %v4044_v43  ;;  %v136_v43 = vmul.f32 %v135_v53, %v107_v23  ;;  %v4399_v53 = vsub.f32 %v336_v9, %v4374_v22  ;;  %v304_v57 = vld [vmem:[#allocation2 + $0x160] sm:$0xff] }
  0xd0   :  { %1677 = vmatpush.msrb.mxu2 %v1496_v11  ;;  %1728 = vmatpush.msrb.mxu3 %v4068_v45  ;;  %v280_v9 = vld [vmem:[#allocation2 + $0xa0] sm:$0xff] }
  0xd1   :  { %1579 = vmatpush.msrb.mxu0 %v4115_v40  ;;  %1620 = vmatpush.msrb.mxu1 %v4068_v45  ;;  %v4313_v45 = vsub.f32 %v384_v27, %v4296_v59  ;;  %v4315_v40 = vand.u32 4294901760, %v376_v37 }
  0xd2   :  { %1681 = vmatpush.msrb.mxu2 %v1502_v20  ;;  %1730 = vmatpush.msrb.mxu3 %v4080_v29  ;;  %v123_v20 = vmul.f32 0.026197849, %v115_v63 }
  0xd3   :  { %1582 = vmatpush.msrb.mxu0 %v4128_v21  ;;  %1622 = vmatpush.msrb.mxu1 %v4080_v29  ;;  %v426_v11 = vpop.f32.mrf.mxu0  ;;  %v368_v29 = vld [vmem:[#allocation2 + $0x360] sm:$0xff]  ;;  %v139_v21 = vsel %vm4305_vm0, %v136_v43, %v133_v47  ;;  %v5497_v35 = vand.u32 4294901760, %v4313_v45 }
  0xd4   :  { %1685 = vmatpush.msrb.mxu2 %v1508_v5  ;;  %1732 = vmatpush.msrb.mxu3 %v4092_v14  ;;  %v360_v5 = vld [vmem:[#allocation2 + $0x320] sm:$0xff]  ;;  %v203_v58 = vmul.f32 %v139_v21, %v123_v20 }
  0xd5   :  { %1585 = vmatpush.msrb.mxu0 %v4141_v16  ;;  %1624 = vmatpush.msrb.mxu1 %v4092_v14  ;;  %v4330_v14 = vsub.f32 %v376_v37, %v4315_v40  ;;  %v4342_v36 = vand.u32 4294901760, %v360_v5 }
  0xd6   :  { %1689 = vmatpush.msrb.mxu2 %v1514_v15  ;;  %1734 = vmatpush.msrb.mxu3 %v4105_v30  ;;  %v4332_v15 = vand.u32 4294901760, %v368_v29 }
  0xd7   :  { %1588 = vmatpush.msrb.mxu0 %v4154_v7  ;;  %1626 = vmatpush.msrb.mxu1 %v4105_v30  ;;  %v211_v7 = vmul.f32 0.5, %v4250_v26  ;;  %v4364_v23 = vsub.f32 %v360_v5, %v4342_v36  ;;  %v4420_v5 = vand.u32 4294901760, %v312_v1 }
  0xd8   :  { %1693 = vmatpush.msrb.mxu2 %v1520_v55  ;;  %1736 = vmatpush.msrb.mxu3 %v4117_v8  ;;  %v227_v55 = vmul.f32 1.5, %v4250_v26 }
  0xd9   :  { %v527_v16 = vpop.f32.mrf.mxu1  ;;  %1591 = vmatpush.msrb.mxu0 %v4167_v13  ;;  %1628 = vmatpush.msrb.mxu1 %v4117_v8  ;;  %v581_v33 = vpop.f32.mrf.mxu2  ;;  %v4346_v8 = vand.u32 4294901760, %v352_v0  ;;  %v1796_v13 = vsub.f32 %v4313_v45, %v5497_v35 }
  0xda   :  { %v528_v30 = vadd.f32 %v527_v16, %v426_v11  ;;  %1697 = vmatpush.msrb.mxu2 %v1526_v49  ;;  %1738 = vmatpush.msrb.mxu3 %v4130_v18  ;;  %v4355_v49 = vsub.f32 %v368_v29, %v4332_v15  ;;  %v296_v11 = vld [vmem:[#allocation2 + $0x120] sm:$0xff]  ;;  %v5489_v16 = vand.u32 4294901760, %v4399_v53 }
  0xdb   :  { %1594 = vmatpush.msrb.mxu0 %v4180_v42  ;;  %1630 = vmatpush.msrb.mxu1 %v4130_v18  ;;  %v620_v41 = vpop.f32.mrf.mxu3  ;;  %v5496_v18 = vand.u32 4294901760, %v4330_v14  ;;  %v219_v42 = vsub.f32 %v203_v58, %v211_v7  ;;  %v1797_v61 = vand.u32 4294901760, %v1796_v13  ;;  %v4435_v58 = vand.u32 4294901760, %v296_v11 }
  0xdc   :  { %v582_v39 = vadd.f32 %v581_v33, %v528_v30  ;;  %1701 = vmatpush.msrb.mxu2 %v1532_v52  ;;  %1740 = vmatpush.msrb.mxu3 %v4143_v38  ;;  %v235_v52 = vadd.f32 -0.42140645, %v227_v55  ;;  %v5495_v63 = vand.u32 4294901760, %v4355_v49  ;;  %v4433_v33 = vand.u32 4294901760, %v304_v57  ;;  %v288_v55 = vld [vmem:[#allocation2 + $0xe0] sm:$0xff] }
  0xdd   :  { %1597 = vmatpush.msrb.mxu0 %v4196_v25  ;;  %1632 = vmatpush.msrb.mxu1 %v4143_v38  ;;  %v4372_v38 = vsub.f32 %v352_v0, %v4346_v8  ;;  %v328_v25 = vld [vmem:[#allocation2 + $0x220] sm:$0xff]  ;;  %v1802_v19 = vsub.f32 %v4330_v14, %v5496_v18  ;;  %v4429_v0 = vsub.f32 %v320_v31, %v4401_v32 }
  0xde   :  { %v621_v48 = vadd.f32 %v620_v41, %v582_v39  ;;  %1705 = vmatpush.msrb.mxu2 %v1538_v62  ;;  %1742 = vmatpush.msrb.mxu3 %v4156_v51  ;;  %v76_v62 = vld [vmem:[#allocation7 + $0x8] sm:$0xff]  ;;  %v4393_v6 = vand.u32 4294901760, %v328_v25  ;;  %v1808_v37 = vsub.f32 %v4355_v49, %v5495_v63  ;;  %5629 = vst [vmem:[#allocation15_spill] sm:$0xff] %v4435_v58  ;;  %v345_v63 = vld [vmem:[#allocation2 + $0x2a8] sm:$0xff] }
  0xdf   :  { %1448 = vmatmul.f32.vlgmr.msra.gmra.mxu2 %v3748_v12  ;;  %1600 = vmatpush.msrb.mxu0 %v4211_v50  ;;  %v689_v2 = vpop.f32.mrf.mxu0  ;;  %v92_v28 = vsub.f32 %v76_v62, %v84_v44  ;;  %v5494_v50 = vand.u32 4294901760, %v4364_v23  ;;  %v5493_v26 = vand.u32 4294901760, %v4372_v38  ;;  %v1803_v43 = vand.u32 4294901760, %v1802_v19  ;;  %v272_v19 = vld [vmem:[#allocation2 + $0x60] sm:$0xff] }
  0xe0   :  { %1634 = vmatpush.msrb.mxu1 %v4156_v51  ;;  %1709 = vmatpush.msrb.mxu2 %v1544_v3  ;;  %v690_v56 = vadd.f32 %v689_v2, %v621_v48  ;;  %v251_v51 = vsel %vm243_vm1, %v219_v42, %v235_v52  ;;  %v4391_v3 = vsub.f32 %v344_v24, %v4366_v46  ;;  %v1809_v30 = vand.u32 4294901760, %v1808_v37 }
  0xe1   :  { %1744 = vmatpush.msrb.mxu3 %v4172_v54  ;;  %1753 = vmatpush.msra.mxu0 %v4296_v59  ;;  %v726_v60 = vpop.f32.mrf.mxu1  ;;  %v1814_v29 = vsub.f32 %v4364_v23, %v5494_v50  ;;  %v4418_v21 = vsub.f32 %v328_v25, %v4393_v6  ;;  %v4448_v41 = vsub.f32 %v312_v1, %v4420_v5  ;;  %v5487_v52 = vand.u32 4294901760, %v4429_v0  ;;  %v385_v1 = vld [vmem:[#allocation2 + $0x3e8] sm:$0xff] }
  0xe2   :  { %1549 = vmatmul.f32.vlgmr.msra.gmra.mxu3 %v5616_v4  ;;  %1896 = vmatpush.msra.mxu2 %v4313_v45  ;;  %v727_v27 = vadd.f32 %v726_v60, %v690_v56  ;;  %v5492_v20 = vand.u32 4294901760, %v4391_v3  ;;  %v1832_v42 = vsub.f32 %v4399_v53, %v5489_v16  ;;  %v4458_v2 = vsub.f32 %v304_v57, %v4433_v33  ;;  %v377_v57 = vld [vmem:[#allocation2 + $0x3a8] sm:$0xff] }
  0xe3   :  { %1636 = vmatpush.msrb.mxu1 %v4172_v54  ;;  %1746 = vmatpush.msrb.mxu3 %v4190_v34  ;;  %v4408_v54 = vand.u32 2147483647, %v92_v28  ;;  %v1815_v39 = vand.u32 4294901760, %v1814_v29  ;;  %v5488_v13 = vand.u32 4294901760, %v4418_v21  ;;  %v4461_v25 = vsub.f32 %v296_v11, %v4435_v58 }
  0xe4   :  { %1755 = vmatpush.msra.mxu0 %v4315_v40  ;;  %1899 = vmatpush.msra.mxu2 %v4330_v14  ;;  %v3116_v47 = vmul.f32 %v727_v27, %v251_v51  ;;  %v1826_v24 = vsub.f32 %v4391_v3, %v5492_v20  ;;  %v4463_v62 = vand.u32 4294901760, %v288_v55  ;;  %v4470_v56 = vand.u32 4294901760, %v280_v9  ;;  %v264_v27 = vld [vmem:[#allocation2 + $0x20] sm:$0xff] }
  0xe5   :  { %1949 = vmatpush.msra.mxu3 %v4296_v59  ;;  %1638 = vmatpush.msrb.mxu1 %v4190_v34  ;;  %v1820_v34 = vsub.f32 %v4372_v38, %v5493_v26  ;;  %v4438_v7 = vmul.f32 19.085537, %v4408_v54  ;;  %v1838_v28 = vsub.f32 %v4418_v21, %v5488_v13  ;;  %v1833_v51 = vand.u32 4294901760, %v1832_v42 }
  0xe6   :  { %1757 = vmatpush.msra.mxu0 %v4332_v15  ;;  %3124 = vst [vmem:[#allocation10] sm:$0xff] %v3116_v47  ;;  %1902 = vmatpush.msra.mxu2 %v4355_v49  ;;  %v1827_v31 = vand.u32 4294901760, %v1826_v24  ;;  %v1844_v60 = vsub.f32 %v4429_v0, %v5487_v52  ;;  %v5490_v37 = vand.u32 4294901760, %v4458_v2  ;;  %v4485_v47 = vsub.f32 %v288_v55, %v4463_v62  ;;  %v361_v52 = vld [vmem:[#allocation2 + $0x328] sm:$0xff] }
  0xe7   :  { %1798 = vmatpush.msra.mxu1 %v1797_v61  ;;  %1951 = vmatpush.msra.mxu3 %v4315_v40  ;;  %v1821_v48 = vand.u32 4294901760, %v1820_v34  ;;  %5630 = vst [vmem:[#allocation17_spill] sm:$0xff] %v4463_v62  ;;  %v4466_v44 = vadd.f32 1.0, %v4438_v7  ;;  %v5486_v61 = vand.u32 4294901760, %v4448_v41  ;;  %v4492_v11 = vsub.f32 %v280_v9, %v4470_v56 }
  0xe8   :  { %1711 = vmatmul.f32.vlgmr.msrb.gmra.mxu2 %v5616_v4  ;;  %1759 = vmatpush.msra.mxu0 %v4342_v36  ;;  %5631 = vst [vmem:[#allocation16_spill] sm:$0xff] %v4470_v56  ;;  %v4494_v29 = vand.u32 4294901760, %v272_v19  ;;  %v143_v34 = vmul.f32 -0.5, %v4438_v7  ;;  %v4503_v24 = vand.u32 4294901760, %v385_v1  ;;  %v4507_v9 = vand.u32 4294901760, %v377_v57 }
  0xe9   :  { %1804 = vmatpush.msra.mxu1 %v1803_v43  ;;  %1905 = vmatpush.msra.mxu2 %v4364_v23  ;;  %v5491_v43 = vand.u32 4294901760, %v4461_v25  ;;  %3160 = vlog2.f32 %v4466_v44  ;;  %v1850_v55 = vsub.f32 %v4448_v41, %v5486_v61  ;;  %v1856_v42 = vsub.f32 %v4458_v2, %v5490_v37  ;;  %v369_v61 = vld [vmem:[#allocation2 + $0x368] sm:$0xff] }
  0xea   :  { %1953 = vmatpush.msra.mxu3 %v4332_v15  ;;  %1603 = vmatmul.f32.vlgmr.msrb.gmra.mxu0 %v3700_v10  ;;  %5632 = vst [vmem:[#allocation18_spill] sm:$0xff] %v4494_v29  ;;  %v4520_v13 = vsub.f32 %v272_v19, %v4494_v29  ;;  %v4528_v20 = vsub.f32 %v385_v1, %v4503_v24  ;;  %v146_v26 = vand.u32 2147483647, %v4438_v7  ;;  %v4533_v19 = vand.u32 4294901760, %v369_v61 }
  0xeb   :  { %1748 = vmatmul.f32.vlgmr.msrb.gmra.mxu3 %v5616_v4  ;;  %1761 = vmatpush.msra.mxu0 %v4346_v8  ;;  %v1851_v37 = vand.u32 4294901760, %v1850_v55  ;;  %v4538_v50 = vand.u32 4294901760, %v361_v52  ;;  %v212_v10 = vmul.f32 0.5, %v4408_v54  ;;  %vm244_vm3 = vcmp.lt.f32.partialorder %v4408_v54, 1.0 }
  0xec   :  { %1810 = vmatpush.msra.mxu1 %v1809_v30  ;;  %1908 = vmatpush.msra.mxu2 %v4372_v38  ;;  %v1839_v30 = vand.u32 4294901760, %v1838_v28  ;;  %v5498_v28 = vand.u32 4294901760, %v4485_v47  ;;  %5633 = vst [vmem:[#allocation19_spill] sm:$0xff] %v4528_v20  ;;  %v5505_v18 = vand.u32 4294901760, %v4520_v13  ;;  %vm4556_vm2 = vcmp.lt.f32.partialorder %v146_v26, 0.0004427343 }
  0xed   :  { %1955 = vmatpush.msra.mxu3 %v4342_v36  ;;  %1642 = vmatmul.f32.vlgmr.msrb.gmra.mxu1 %v3721_v17 }
  0xee   :  { %1763 = vmatpush.msra.mxu0 %v4366_v46  ;;  %1816 = vmatpush.msra.mxu1 %v1815_v39  ;;  %v4501_v39 = vand.u32 4294901760, %v264_v27  ;;  %v1868_v55 = vsub.f32 %v4485_v47, %v5498_v28 }
  0xef   :  { %1911 = vmatpush.msra.mxu2 %v4391_v3  ;;  %1957 = vmatpush.msra.mxu3 %v4346_v8  ;;  %v3161_v16 = vpop.eup %3160 }
  0xf0   :  { %1765 = vmatpush.msra.mxu0 %v4374_v22  ;;  %1822 = vmatpush.msra.mxu1 %v1821_v48  ;;  %v1845_v48 = vand.u32 4294901760, %v1844_v60  ;;  %v144_v60 = vadd.f32 1.0, %v143_v34  ;;  %v4536_v34 = vsub.f32 %v377_v57, %v4507_v9  ;;  %v142_v35 = vmul.f32 0.6931472, %v3161_v16 }
  0xf1   :  { %1914 = vmatpush.msra.mxu2 %v4399_v53  ;;  %1959 = vmatpush.msra.mxu3 %v4366_v46  ;;  %v1869_v26 = vand.u32 4294901760, %v1868_v55 }
  0xf2   :  { %1767 = vmatpush.msra.mxu0 %v4393_v6  ;;  %1828 = vmatpush.msra.mxu1 %v1827_v31  ;;  %v1862_v31 = vsub.f32 %v4461_v25, %v5491_v43  ;;  %v4525_v43 = vsub.f32 %v264_v27, %v4501_v39  ;;  %5634 = vst [vmem:[#allocation24_spill] sm:$0xff] %v4536_v34  ;;  %v1857_v27 = vand.u32 4294901760, %v1856_v42  ;;  %v124_v42 = vmul.f32 0.026197849, %v4466_v44 }
  0xf3   :  { %1917 = vmatpush.msra.mxu2 %v4418_v21  ;;  %1961 = vmatpush.msra.mxu3 %v4374_v22  ;;  %v5640_v4 = vand.u32 4294901760, %v4536_v34 }
  0xf4   :  { %1769 = vmatpush.msra.mxu0 %v4401_v32  ;;  %1834 = vmatpush.msra.mxu1 %v1833_v51  ;;  %v5500_v51 = vand.u32 4294901760, %v4492_v11  ;;  %v1863_v1 = vand.u32 4294901760, %v1862_v31  ;;  %v5639_v44 = vand.u32 4294901760, %v4525_v43 }
  0xf5   :  { %1920 = vmatpush.msra.mxu2 %v4429_v0  ;;  %1963 = vmatpush.msra.mxu3 %v4393_v6 }
  0xf6   :  { %1771 = vmatpush.msra.mxu0 %v4420_v5  ;;  %1840 = vmatpush.msra.mxu1 %v1839_v30  ;;  %v353_v30 = vld [vmem:[#allocation2 + $0x2e8] sm:$0xff]  ;;  %v1874_v57 = vsub.f32 %v4492_v11, %v5500_v51  ;;  %v1886_v17 = vsub.f32 %v4525_v43, %v5639_v44 }
  0xf7   :  { %1923 = vmatpush.msra.mxu2 %v4448_v41  ;;  %1965 = vmatpush.msra.mxu3 %v4401_v32  ;;  %v4554_v28 = vand.u32 4294901760, %v353_v30  ;;  %v337_v51 = vld [vmem:[#allocation2 + $0x268] sm:$0xff] }
  0xf8   :  { %1773 = vmatpush.msra.mxu0 %v4433_v33  ;;  %1846 = vmatpush.msra.mxu1 %v1845_v48  ;;  %v145_v48 = vmul.f32 %v144_v60, %v4438_v7  ;;  %v4564_v7 = vsub.f32 %v369_v61, %v4533_v19  ;;  %v4569_v60 = vand.u32 4294901760, %v345_v63  ;;  %v1875_v16 = vand.u32 4294901760, %v1874_v57 }
  0xf9   :  { %1926 = vmatpush.msra.mxu2 %v4458_v2  ;;  %1967 = vmatpush.msra.mxu3 %v4420_v5  ;;  %v4588_v57 = vsub.f32 %v353_v30, %v4554_v28  ;;  %v4590_v12 = vand.u32 4294901760, %v337_v51 }
  0xfa   :  { %1775 = vmatpush.msra.mxu0 %v4435_v58  ;;  %1852 = vmatpush.msra.mxu1 %v1851_v37  ;;  %5637 = vst [vmem:[#allocation25_spill] sm:$0xff] %v4564_v7  ;;  %v4567_v37 = vsub.f32 %v361_v52, %v4538_v50  ;;  %v1880_v52 = vsub.f32 %v4520_v13, %v5505_v18  ;;  %v329_v18 = vld [vmem:[#allocation2 + $0x228] sm:$0xff] }
  0xfb   :  { %1929 = vmatpush.msra.mxu2 %v4461_v25  ;;  %1969 = vmatpush.msra.mxu3 %v4433_v33  ;;  %v148_v61 = vsel %vm4556_vm2, %v145_v48, %v142_v35  ;;  %v4597_v35 = vsub.f32 %v4536_v34, %v5640_v4  ;;  %v4602_v30 = vsub.f32 %v345_v63, %v4569_v60  ;;  %v5641_v34 = vand.u32 4294901760, %v4564_v7 }
  0xfc   :  { %1777 = vmatpush.msra.mxu0 %v4463_v62  ;;  %1858 = vmatpush.msra.mxu1 %v1857_v27  ;;  %v767_v31 = vpop.f32.mrf.mxu2  ;;  %v5638_v27 = vand.u32 4294901760, %v4528_v20  ;;  %v1881_v4 = vand.u32 4294901760, %v1880_v52 }
  0xfd   :  { %1932 = vmatpush.msra.mxu2 %v4485_v47  ;;  %1971 = vmatpush.msra.mxu3 %v4435_v58  ;;  %v321_v58 = vld [vmem:[#allocation2 + $0x1e8] sm:$0xff]  ;;  %v2144_v52 = vand.u32 4294901760, %v4597_v35 }
  0xfe   :  { %1779 = vmatpush.msra.mxu0 %v4470_v56  ;;  %1864 = vmatpush.msra.mxu1 %v1863_v1  ;;  %v2137_v55 = vsub.f32 %v4528_v20, %v5638_v27  ;;  %v204_v20 = vmul.f32 %v148_v61, %v124_v42  ;;  %v4609_v27 = vand.u32 4294901760, %v329_v18  ;;  %v313_v61 = vld [vmem:[#allocation2 + $0x1a8] sm:$0xff] }
  0xff   :  { %1935 = vmatpush.msra.mxu2 %v4492_v11  ;;  %1973 = vmatpush.msra.mxu3 %v4463_v62  ;;  %v868_v48 = vpop.f32.mrf.mxu3  ;;  %v228_v62 = vmul.f32 1.5, %v4408_v54 }
 0x100   :  { %1781 = vmatpush.msra.mxu0 %v4494_v29  ;;  %1870 = vmatpush.msra.mxu1 %v1869_v26  ;;  %v869_v44 = vadd.f32 %v868_v48, %v767_v31  ;;  %v2138_v63 = vand.u32 4294901760, %v2137_v55  ;;  %v4614_v31 = vsub.f32 %v337_v51, %v4590_v12  ;;  %v1887_v48 = vand.u32 4294901760, %v1886_v17 }
 0x101   :  { %1938 = vmatpush.msra.mxu2 %v4520_v13  ;;  %1975 = vmatpush.msra.mxu3 %v4470_v56  ;;  %v922_v1 = vpop.f32.mrf.mxu0  ;;  %v2149_v56 = vsub.f32 %v4564_v7, %v5641_v34  ;;  %v5642_v55 = vand.u32 4294901760, %v4313_v45  ;;  %v5643_v51 = vand.u32 4294901760, %v4567_v37  ;;  %v220_v42 = vsub.f32 %v204_v20, %v212_v10 }
 0x102   :  { %1783 = vmatpush.msra.mxu0 %v4501_v39  ;;  %1876 = vmatpush.msra.mxu1 %v1875_v16  ;;  %v923_v26 = vadd.f32 %v922_v1, %v869_v44  ;;  %v4622_v16 = vand.u32 4294901760, %v321_v58  ;;  %v236_v35 = vadd.f32 -0.42140645, %v228_v62  ;;  %v4634_v45 = vsub.f32 %v329_v18, %v4609_v27 }
 0x103   :  { %1941 = vmatpush.msra.mxu2 %v4525_v43  ;;  %1977 = vmatpush.msra.mxu3 %v4494_v29  ;;  %v2155_v1 = vsub.f32 %v4567_v37, %v5643_v51  ;;  %v305_v29 = vld [vmem:[#allocation2 + $0x168] sm:$0xff]  ;;  %v5644_v51 = vand.u32 4294901760, %v4330_v14  ;;  %v5645_v10 = vand.u32 4294901760, %v4588_v57  ;;  %v5646_v14 = vand.u32 4294901760, %v4355_v49 }
 0x104   :  { %1990 = vmatpush.msrb.mxu0 %v5642_v55  ;;  %v961_v44 = vpop.f32.mrf.mxu1  ;;  %1882 = vmatpush.msra.mxu1 %v1881_v4  ;;  %v4636_v55 = vand.u32 4294901760, %v313_v61  ;;  %v297_v4 = vld [vmem:[#allocation2 + $0x128] sm:$0xff]  ;;  %v4646_v18 = vsub.f32 %v321_v58, %v4622_v16  ;;  %v4648_v17 = vand.u32 4294901760, %v305_v29 }
 0x105   :  { %2094 = vmatpush.msrb.mxu2 %v4503_v24  ;;  %1979 = vmatpush.msra.mxu3 %v4501_v39  ;;  %v962_v34 = vadd.f32 %v961_v44, %v923_v26  ;;  %v1030_v7 = vpop.f32.mrf.mxu2  ;;  %v2161_v20 = vsub.f32 %v4588_v57, %v5645_v10  ;;  %v2150_v26 = vand.u32 4294901760, %v2149_v56  ;;  %v5647_v10 = vand.u32 4294901760, %v4602_v30 }
 0x106   :  { %1994 = vmatpush.msrb.mxu0 %v5644_v51  ;;  %1888 = vmatpush.msra.mxu1 %v1887_v48  ;;  %v2156_v51 = vand.u32 4294901760, %v2155_v1  ;;  %v2178_v48 = vand.u32 4294901760, %v4634_v45  ;;  %v4661_v49 = vsub.f32 %v313_v61, %v4636_v55  ;;  %v5648_v1 = vand.u32 4294901760, %v4364_v23 }
 0x107   :  { %2096 = vmatpush.msrb.mxu2 %v4507_v9  ;;  %2139 = vmatpush.msrb.mxu3 %v2138_v63  ;;  %v1031_v44 = vadd.f32 %v1030_v7, %v962_v34  ;;  %v2167_v62 = vsub.f32 %v4602_v30, %v5647_v10  ;;  %v252_v63 = vsel %vm244_vm3, %v220_v42, %v236_v35  ;;  %v289_v7 = vld [vmem:[#allocation2 + $0xe8] sm:$0xff]  ;;  %v2162_v54 = vand.u32 4294901760, %v2161_v20 }
 0x108   :  { %1998 = vmatpush.msrb.mxu0 %v5646_v14  ;;  %2057 = vmatpush.msrb.mxu1 %v4296_v59  ;;  %v1067_v56 = vpop.f32.mrf.mxu3  ;;  %v4663_v59 = vand.u32 4294901760, %v297_v4  ;;  %v5649_v42 = vand.u32 4294901760, %v4614_v31  ;;  %v281_v34 = vld [vmem:[#allocation2 + $0xa8] sm:$0xff]  ;;  %v2184_v61 = vand.u32 4294901760, %v4646_v18  ;;  %v4676_v14 = vand.u32 4294901760, %v289_v7 }
 0x109   :  { %2098 = vmatpush.msrb.mxu2 %v4533_v19  ;;  %2145 = vmatpush.msrb.mxu3 %v2144_v52  ;;  %v1068_v58 = vadd.f32 %v1067_v56, %v1031_v44  ;;  %v4674_v44 = vsub.f32 %v305_v29, %v4648_v17  ;;  %v5650_v23 = vand.u32 4294901760, %v4372_v38  ;;  %v2179_v20 = vsub.f32 %v4634_v45, %v2178_v48  ;;  %v273_v38 = vld [vmem:[#allocation2 + $0x68] sm:$0xff] }
 0x10a   :  { %2002 = vmatpush.msrb.mxu0 %v5648_v1  ;;  %2059 = vmatpush.msrb.mxu1 %v4315_v40  ;;  %v2173_v35 = vsub.f32 %v4614_v31, %v5649_v42  ;;  %v2168_v40 = vand.u32 4294901760, %v2167_v62  ;;  %v4687_v29 = vsub.f32 %v297_v4, %v4663_v59  ;;  %v4689_v10 = vand.u32 4294901760, %v281_v34 }
 0x10b   :  { %2100 = vmatpush.msrb.mxu2 %v4538_v50  ;;  %2151 = vmatpush.msrb.mxu3 %v2150_v26  ;;  %v3117_v52 = vmul.f32 %v1068_v58, %v252_v63  ;;  %v2190_v26 = vand.u32 4294901760, %v4661_v49  ;;  %v5651_v63 = vand.u32 4294901760, %v4391_v3  ;;  %v2185_v62 = vsub.f32 %v4646_v18, %v2184_v61 }
 0x10c   :  { %2006 = vmatpush.msrb.mxu0 %v5650_v23  ;;  %2061 = vmatpush.msrb.mxu1 %v4332_v15  ;;  %v2174_v15 = vand.u32 4294901760, %v2173_v35  ;;  %v4700_v4 = vsub.f32 %v289_v7, %v4676_v14  ;;  %v5652_v56 = vand.u32 4294901760, %v4399_v53  ;;  %v4705_v3 = vand.u32 4294901760, %v273_v38 }
 0x10d   :  { %2102 = vmatpush.msrb.mxu2 %v4554_v28  ;;  %2157 = vmatpush.msrb.mxu3 %v2156_v51  ;;  %3125 = vst [vmem:[#allocation10 + $0x8] sm:$0xff] %v3117_v52  ;;  %v2196_v51 = vand.u32 4294901760, %v4674_v44  ;;  %v2180_v58 = vand.u32 4294901760, %v2179_v20  ;;  %v2191_v1 = vsub.f32 %v4661_v49, %v2190_v26  ;;  %v4713_v7 = vsub.f32 %v281_v34, %v4689_v10 }
 0x10e   :  { %2010 = vmatpush.msrb.mxu0 %v5651_v63  ;;  %2063 = vmatpush.msrb.mxu1 %v4342_v36  ;;  %v265_v36 = vld [vmem:[#allocation2 + $0x28] sm:$0xff]  ;;  %v5653_v53 = vand.u32 4294901760, %v4418_v21  ;;  %v2208_v35 = vand.u32 4294901760, %v4700_v4  ;;  %v5654_v34 = vand.u32 4294901760, %v4429_v0  ;;  %v4729_v21 = vsub.f32 %v273_v38, %v4705_v3 }
 0x10f   :  { %2104 = vmatpush.msrb.mxu2 %v4569_v60  ;;  %2163 = vmatpush.msrb.mxu3 %v2162_v54  ;;  %v2202_v54 = vand.u32 4294901760, %v4687_v29  ;;  %v2197_v42 = vsub.f32 %v4674_v44, %v2196_v51  ;;  %v4723_v52 = vand.u32 4294901760, %v265_v36  ;;  %v5655_v20 = vand.u32 4294901760, %v4448_v41 }
 0x110   :  { %2014 = vmatpush.msrb.mxu0 %v5652_v56  ;;  %2065 = vmatpush.msrb.mxu1 %v4346_v8  ;;  %v2186_v8 = vand.u32 4294901760, %v2185_v62  ;;  %v2209_v0 = vsub.f32 %v4700_v4, %v2208_v35  ;;  %v5656_v63 = vand.u32 4294901760, %v4458_v2  ;;  %v2220_v41 = vand.u32 4294901760, %v4729_v21 }
 0x111   :  { %2106 = vmatpush.msrb.mxu2 %v4590_v12  ;;  %2169 = vmatpush.msrb.mxu3 %v2168_v40  ;;  %v2203_v23 = vsub.f32 %v4687_v29, %v2202_v54  ;;  %v2214_v40 = vand.u32 4294901760, %v4713_v7  ;;  %v4744_v38 = vsub.f32 %v265_v36, %v4723_v52  ;;  %v5657_v62 = vand.u32 4294901760, %v4461_v25 }
 0x112   :  { %2018 = vmatpush.msrb.mxu0 %v5653_v53  ;;  %2067 = vmatpush.msrb.mxu1 %v4366_v46  ;;  %v2192_v46 = vand.u32 4294901760, %v2191_v1  ;;  %v2210_v2 = vand.u32 4294901760, %v2209_v0  ;;  %v5658_v56 = vand.u32 4294901760, %v4485_v47  ;;  %v2221_v36 = vsub.f32 %v4729_v21, %v2220_v41  ;;  %v5662_v1 = vld [vmem:[#allocation17_spill] sm:$0xff]  ;;  %v5667_v0 = vld [vmem:[#allocation22_spill] sm:$0xff] }
 0x113   :  { %2108 = vmatpush.msrb.mxu2 %v4609_v27  ;;  %2175 = vmatpush.msrb.mxu3 %v2174_v15  ;;  %v2215_v15 = vsub.f32 %v4713_v7, %v2214_v40  ;;  %v5661_v47 = vand.u32 4294901760, %v4520_v13 }
 0x114   :  { %2022 = vmatpush.msrb.mxu0 %v5654_v34  ;;  %2069 = vmatpush.msrb.mxu1 %v4374_v22  ;;  %v2198_v22 = vand.u32 4294901760, %v2197_v42  ;;  %v2222_v53 = vand.u32 4294901760, %v2221_v36  ;;  %v5663_v42 = vld [vmem:[#allocation21_spill] sm:$0xff]  ;;  %v5664_v34 = vand.u32 4294901760, %v4525_v43  ;;  %v5670_v43 = vld [vmem:[#allocation18_spill] sm:$0xff] }
 0x115   :  { %2110 = vmatpush.msrb.mxu2 %v4622_v16  ;;  %2181 = vmatpush.msrb.mxu3 %v2180_v58  ;;  %v2216_v25 = vand.u32 4294901760, %v2215_v15  ;;  %v5660_v58 = vld [vmem:[#allocation15_spill] sm:$0xff]  ;;  %v5671_v15 = vld [vmem:[#allocation20_spill] sm:$0xff]  ;;  %v5674_v36 = vld [vmem:[#allocation25_spill] sm:$0xff] }
 0x116   :  { %2026 = vmatpush.msrb.mxu0 %v5655_v20  ;;  %2071 = vmatpush.msrb.mxu1 %v4393_v6  ;;  %v2204_v6 = vand.u32 4294901760, %v2203_v23  ;;  %v5665_v23 = vld [vmem:[#allocation16_spill] sm:$0xff]  ;;  %v5666_v20 = vld [vmem:[#allocation23_spill] sm:$0xff] }
 0x117   :  { %2112 = vmatpush.msrb.mxu2 %v4636_v55  ;;  %2187 = vmatpush.msrb.mxu3 %v2186_v8  ;;  %v85_v8 = vld [vmem:[#allocation8 + $0x10] sm:$0xff] }
 0x118   :  { %2030 = vmatpush.msrb.mxu0 %v5656_v63  ;;  %2073 = vmatpush.msrb.mxu1 %v4401_v32  ;;  %v2226_v32 = vand.u32 4294901760, %v4744_v38  ;;  %v5668_v63 = vld [vmem:[#allocation19_spill] sm:$0xff] }
 0x119   :  { %2114 = vmatpush.msrb.mxu2 %v4648_v17  ;;  %2193 = vmatpush.msrb.mxu3 %v2192_v46 }
 0x11a   :  { %2034 = vmatpush.msrb.mxu0 %v5657_v62  ;;  %2075 = vmatpush.msrb.mxu1 %v4420_v5  ;;  %v5659_v5 = vand.u32 4294901760, %v4492_v11  ;;  %v77_v11 = vld [vmem:[#allocation7 + $0x10] sm:$0xff] }
 0x11b   :  { %2116 = vmatpush.msrb.mxu2 %v4663_v59  ;;  %2199 = vmatpush.msrb.mxu3 %v2198_v22  ;;  %v93_v46 = vsub.f32 %v77_v11, %v85_v8 }
 0x11c   :  { %2038 = vmatpush.msrb.mxu0 %v5658_v56  ;;  %2077 = vmatpush.msrb.mxu1 %v4433_v33  ;;  %v2227_v33 = vsub.f32 %v4744_v38, %v2226_v32 }
 0x11d   :  { %2118 = vmatpush.msrb.mxu2 %v4676_v14  ;;  %2205 = vmatpush.msrb.mxu3 %v2204_v6  ;;  %v4783_v22 = vand.u32 2147483647, %v93_v46  ;;  %v5669_v6 = vand.u32 4294901760, %v5668_v63  ;;  %v346_v46 = vld [vmem:[#allocation2 + $0x2b0] sm:$0xff] }
 0x11e   :  { %2042 = vmatpush.msrb.mxu0 %v5659_v5  ;;  %2079 = vmatpush.msrb.mxu1 %v5660_v58  ;;  %v2228_v13 = vand.u32 4294901760, %v2227_v33  ;;  %v5676_v58 = vand.u32 4294901760, %v4567_v37 }
 0x11f   :  { %2120 = vmatpush.msrb.mxu2 %v4689_v10  ;;  %2211 = vmatpush.msrb.mxu3 %v2210_v2  ;;  %v109_v62 = vmul.f32 19.085537, %v4783_v22  ;;  %v5672_v2 = vld [vmem:[#allocation24_spill] sm:$0xff]  ;;  %vm245_vm5 = vcmp.lt.f32.partialorder %v4783_v22, 1.0 }
 0x120   :  { %2046 = vmatpush.msrb.mxu0 %v5661_v47  ;;  %2081 = vmatpush.msrb.mxu1 %v5662_v1  ;;  %v5673_v56 = vand.u32 4294901760, %v5672_v2  ;;  %v354_v1 = vld [vmem:[#allocation2 + $0x2f0] sm:$0xff] }
 0x121   :  { %2122 = vmatpush.msrb.mxu2 %v4705_v3  ;;  %2217 = vmatpush.msrb.mxu3 %v2216_v25  ;;  %v5675_v25 = vand.u32 4294901760, %v5674_v36  ;;  %v117_v5 = vadd.f32 1.0, %v109_v62 }
 0x122   :  { %1944 = vmatmul.f32.vlgmr.msra.gmra.mxu2 %v5663_v42  ;;  %2050 = vmatpush.msrb.mxu0 %v5664_v34 }
 0x123   :  { %2083 = vmatpush.msrb.mxu1 %v5665_v23  ;;  %2124 = vmatpush.msrb.mxu2 %v4723_v52  ;;  %3162 = vlog2.f32 %v117_v5 }
 0x124   :  { %2223 = vmatpush.msrb.mxu3 %v2222_v53  ;;  %1789 = vmatmul.f32.vlgmr.msra.gmra.mxu0 %v5666_v20 }
 0x125   :  { %1983 = vmatmul.f32.vlgmr.msra.gmra.mxu3 %v5667_v0  ;;  %2237 = vmatpush.msra.mxu0 %v5668_v63 }
 0x126   :  { %2331 = vmatpush.msra.mxu2 %v5669_v6  ;;  %2085 = vmatpush.msrb.mxu1 %v5670_v43  ;;  %v4899_v43 = vand.u32 4294901760, %v346_v46 }
 0x127   :  { %2229 = vmatpush.msrb.mxu3 %v2228_v13  ;;  %1890 = vmatmul.f32.vlgmr.msra.gmra.mxu1 %v5671_v15  ;;  %v338_v13 = vld [vmem:[#allocation2 + $0x270] sm:$0xff] }
 0x128   :  { %2240 = vmatpush.msra.mxu0 %v5672_v2  ;;  %2335 = vmatpush.msra.mxu2 %v5673_v56  ;;  %v4907_v2 = vand.u32 4294901760, %v338_v13  ;;  %v86_v56 = vld [vmem:[#allocation8 + $0x18] sm:$0xff] }
 0x129   :  { %2398 = vmatpush.msra.mxu3 %v4503_v24  ;;  %2087 = vmatpush.msrb.mxu1 %v4501_v39  ;;  %v5677_v39 = vand.u32 4294901760, %v4588_v57  ;;  %v3163_v33 = vpop.eup %3162 }
 0x12a   :  { %2243 = vmatpush.msra.mxu0 %v5674_v36  ;;  %2339 = vmatpush.msra.mxu2 %v5675_v25 }
 0x12b   :  { %2290 = vmatpush.msra.mxu1 %v4503_v24  ;;  %2400 = vmatpush.msra.mxu3 %v4507_v9  ;;  %v152_v24 = vmul.f32 -0.5, %v109_v62 }
 0x12c   :  { %2246 = vmatpush.msra.mxu0 %v4567_v37  ;;  %2343 = vmatpush.msra.mxu2 %v5676_v58  ;;  %v5679_v37 = vand.u32 4294901760, %v4614_v31 }
 0x12d   :  { %2292 = vmatpush.msra.mxu1 %v4507_v9  ;;  %2402 = vmatpush.msra.mxu3 %v4533_v19  ;;  %v5678_v9 = vand.u32 4294901760, %v4602_v30 }
 0x12e   :  { %2052 = vmatmul.f32.vlgmr.msrb.gmra.mxu0 %v5671_v15  ;;  %2347 = vmatpush.msra.mxu2 %v5677_v39 }
 0x12f   :  { %2294 = vmatpush.msra.mxu1 %v4533_v19  ;;  %2249 = vmatpush.msra.mxu0 %v4588_v57  ;;  %v386_v19 = vld [vmem:[#allocation2 + $0x3f0] sm:$0xff]  ;;  %v153_v57 = vadd.f32 1.0, %v152_v24 }
 0x130   :  { %2404 = vmatpush.msra.mxu3 %v4538_v50  ;;  %2089 = vmatmul.f32.vlgmr.msrb.gmra.mxu1 %v5671_v15 }
 0x131   :  { %2252 = vmatpush.msra.mxu0 %v4602_v30  ;;  %2296 = vmatpush.msra.mxu1 %v4538_v50  ;;  %v155_v50 = vand.u32 2147483647, %v109_v62  ;;  %v4829_v30 = vand.u32 4294901760, %v386_v19 }
 0x132   :  { %2351 = vmatpush.msra.mxu2 %v5678_v9  ;;  %2406 = vmatpush.msra.mxu3 %v4554_v28 }
 0x133   :  { %2255 = vmatpush.msra.mxu0 %v4614_v31  ;;  %2298 = vmatpush.msra.mxu1 %v4554_v28  ;;  %v378_v28 = vld [vmem:[#allocation2 + $0x3b0] sm:$0xff]  ;;  %v151_v31 = vmul.f32 0.6931472, %v3163_v33  ;;  %vm4838_vm4 = vcmp.lt.f32.partialorder %v155_v50, 0.0004427343 }
 0x134   :  { %2355 = vmatpush.msra.mxu2 %v5679_v37  ;;  %2408 = vmatpush.msra.mxu3 %v4569_v60  ;;  %v314_v50 = vld [vmem:[#allocation2 + $0x1b0] sm:$0xff] }
 0x135   :  { %2258 = vmatpush.msra.mxu0 %v4634_v45  ;;  %2300 = vmatpush.msra.mxu1 %v4569_v60  ;;  %v154_v60 = vmul.f32 %v153_v57, %v109_v62  ;;  %v4932_v57 = vsub.f32 %v338_v13, %v4907_v2  ;;  %v306_v45 = vld [vmem:[#allocation2 + $0x170] sm:$0xff] }
 0x136   :  { %2359 = vmatpush.msra.mxu2 %v2178_v48  ;;  %2410 = vmatpush.msra.mxu3 %v4590_v12  ;;  %v282_v13 = vld [vmem:[#allocation2 + $0xb0] sm:$0xff] }
 0x137   :  { %2261 = vmatpush.msra.mxu0 %v4646_v18  ;;  %2302 = vmatpush.msra.mxu1 %v4590_v12  ;;  %v4846_v12 = vsub.f32 %v386_v19, %v4829_v30  ;;  %v4848_v18 = vand.u32 4294901760, %v378_v28 }
 0x138   :  { %2363 = vmatpush.msra.mxu2 %v2184_v61  ;;  %2412 = vmatpush.msra.mxu3 %v4609_v27  ;;  %v125_v61 = vmul.f32 0.026197849, %v117_v5  ;;  %v322_v5 = vld [vmem:[#allocation2 + $0x1f0] sm:$0xff] }
 0x139   :  { %2264 = vmatpush.msra.mxu0 %v4661_v49  ;;  %2304 = vmatpush.msra.mxu1 %v4609_v27  ;;  %v370_v27 = vld [vmem:[#allocation2 + $0x370] sm:$0xff]  ;;  %v157_v49 = vsel %vm4838_vm4, %v154_v60, %v151_v31  ;;  %v5529_v47 = vand.u32 4294901760, %v4846_v12  ;;  %v4934_v33 = vand.u32 4294901760, %v322_v5 }
 0x13a   :  { %2367 = vmatpush.msra.mxu2 %v2190_v26  ;;  %2414 = vmatpush.msra.mxu3 %v4622_v16  ;;  %v362_v26 = vld [vmem:[#allocation2 + $0x330] sm:$0xff]  ;;  %v205_v11 = vmul.f32 %v157_v49, %v125_v61 }
 0x13b   :  { %2267 = vmatpush.msra.mxu0 %v4674_v44  ;;  %2306 = vmatpush.msra.mxu1 %v4622_v16  ;;  %v1108_v48 = vpop.f32.mrf.mxu0  ;;  %v4863_v16 = vsub.f32 %v378_v28, %v4848_v18  ;;  %v4875_v8 = vand.u32 4294901760, %v362_v26 }
 0x13c   :  { %2371 = vmatpush.msra.mxu2 %v2196_v51  ;;  %2416 = vmatpush.msra.mxu3 %v4636_v55  ;;  %v4865_v51 = vand.u32 4294901760, %v370_v27 }
 0x13d   :  { %2270 = vmatpush.msra.mxu0 %v4687_v29  ;;  %2308 = vmatpush.msra.mxu1 %v4636_v55  ;;  %v213_v29 = vmul.f32 0.5, %v4783_v22  ;;  %v4897_v6 = vsub.f32 %v362_v26, %v4875_v8  ;;  %v4953_v26 = vand.u32 4294901760, %v314_v50 }
 0x13e   :  { %2375 = vmatpush.msra.mxu2 %v2202_v54  ;;  %2418 = vmatpush.msra.mxu3 %v4648_v17  ;;  %v1209_v44 = vpop.f32.mrf.mxu1  ;;  %v229_v54 = vmul.f32 1.5, %v4783_v22 }
 0x13f   :  { %2273 = vmatpush.msra.mxu0 %v4700_v4  ;;  %2310 = vmatpush.msra.mxu1 %v4648_v17  ;;  %v1210_v55 = vadd.f32 %v1209_v44, %v1108_v48  ;;  %v1263_v53 = vpop.f32.mrf.mxu2  ;;  %v4879_v17 = vand.u32 4294901760, %v354_v1  ;;  %v2478_v4 = vsub.f32 %v4846_v12, %v5529_v47  ;;  %v298_v48 = vld [vmem:[#allocation2 + $0x130] sm:$0xff]  ;;  %v5521_v44 = vand.u32 4294901760, %v4932_v57 }
 0x140   :  { %2379 = vmatpush.msra.mxu2 %v2208_v35  ;;  %2420 = vmatpush.msra.mxu3 %v4663_v59  ;;  %v4888_v35 = vsub.f32 %v370_v27, %v4865_v51 }
 0x141   :  { %2276 = vmatpush.msra.mxu0 %v4713_v7  ;;  %2312 = vmatpush.msra.mxu1 %v4663_v59  ;;  %v1264_v34 = vadd.f32 %v1263_v53, %v1210_v55  ;;  %v5528_v59 = vand.u32 4294901760, %v4863_v16  ;;  %v221_v7 = vsub.f32 %v205_v11, %v213_v29  ;;  %v2479_v39 = vand.u32 4294901760, %v2478_v4 }
 0x142   :  { %2383 = vmatpush.msra.mxu2 %v2214_v40  ;;  %2422 = vmatpush.msra.mxu3 %v4676_v14  ;;  %v1302_v23 = vpop.f32.mrf.mxu3  ;;  %v237_v40 = vadd.f32 -0.42140645, %v229_v54  ;;  %v5527_v36 = vand.u32 4294901760, %v4888_v35  ;;  %v4966_v53 = vand.u32 4294901760, %v306_v45  ;;  %v4968_v11 = vand.u32 4294901760, %v298_v48  ;;  %v290_v54 = vld [vmem:[#allocation2 + $0xf0] sm:$0xff] }
 0x143   :  { %2279 = vmatpush.msra.mxu0 %v4729_v21  ;;  %2314 = vmatpush.msra.mxu1 %v4676_v14  ;;  %v1303_v63 = vadd.f32 %v1302_v23, %v1264_v34  ;;  %v4905_v14 = vsub.f32 %v354_v1, %v4879_v17  ;;  %v330_v21 = vld [vmem:[#allocation2 + $0x230] sm:$0xff]  ;;  %v2484_v24 = vsub.f32 %v4863_v16, %v5528_v59 }
 0x144   :  { %2387 = vmatpush.msra.mxu2 %v2220_v41  ;;  %2424 = vmatpush.msra.mxu3 %v4689_v10  ;;  %v78_v41 = vld [vmem:[#allocation7 + $0x18] sm:$0xff]  ;;  %v4926_v37 = vand.u32 4294901760, %v330_v21  ;;  %v2490_v28 = vsub.f32 %v4888_v35, %v5527_v36  ;;  %v4962_v1 = vsub.f32 %v322_v5, %v4934_v33  ;;  %5682 = vst [vmem:[#allocation15_spill] sm:$0xff] %v4968_v11  ;;  %v347_v36 = vld [vmem:[#allocation2 + $0x2b8] sm:$0xff] }
 0x145   :  { %2130 = vmatmul.f32.vlgmr.msrb.gmra.mxu2 %v5666_v20  ;;  %2282 = vmatpush.msra.mxu0 %v4744_v38  ;;  %v1371_v62 = vpop.f32.mrf.mxu0  ;;  %v94_v58 = vsub.f32 %v78_v41, %v86_v56  ;;  %v5526_v38 = vand.u32 4294901760, %v4897_v6  ;;  %v5525_v22 = vand.u32 4294901760, %v4905_v14  ;;  %v2485_v60 = vand.u32 4294901760, %v2484_v24  ;;  %v274_v24 = vld [vmem:[#allocation2 + $0x70] sm:$0xff] }
 0x146   :  { %2316 = vmatpush.msra.mxu1 %v4689_v10  ;;  %2391 = vmatpush.msra.mxu2 %v2226_v32  ;;  %v1372_v25 = vadd.f32 %v1371_v62, %v1303_v63  ;;  %v253_v10 = vsel %vm245_vm5, %v221_v7, %v237_v40  ;;  %v4924_v32 = vsub.f32 %v346_v46, %v4899_v43  ;;  %v2491_v55 = vand.u32 4294901760, %v2490_v28 }
 0x147   :  { %2426 = vmatpush.msra.mxu3 %v4705_v3  ;;  %2435 = vmatpush.msrb.mxu0 %v4829_v30  ;;  %v1408_v9 = vpop.f32.mrf.mxu1  ;;  %v2496_v27 = vsub.f32 %v4897_v6, %v5526_v38  ;;  %v4951_v49 = vsub.f32 %v330_v21, %v4926_v37  ;;  %v4981_v23 = vsub.f32 %v314_v50, %v4953_v26  ;;  %v5519_v40 = vand.u32 4294901760, %v4962_v1  ;;  %v387_v50 = vld [vmem:[#allocation2 + $0x3f8] sm:$0xff] }
 0x148   :  { %2231 = vmatmul.f32.vlgmr.msrb.gmra.mxu3 %v5671_v15  ;;  %2578 = vmatpush.msrb.mxu2 %v4846_v12  ;;  %v1409_v19 = vadd.f32 %v1408_v9, %v1372_v25  ;;  %v5524_v61 = vand.u32 4294901760, %v4924_v32  ;;  %v2514_v7 = vsub.f32 %v4932_v57, %v5521_v44  ;;  %v4991_v62 = vsub.f32 %v306_v45, %v4966_v53  ;;  %v379_v45 = vld [vmem:[#allocation2 + $0x3b8] sm:$0xff] }
 0x149   :  { %2318 = vmatpush.msra.mxu1 %v4705_v3  ;;  %2428 = vmatpush.msra.mxu3 %v4723_v52  ;;  %v4941_v3 = vand.u32 2147483647, %v94_v58  ;;  %v2497_v34 = vand.u32 4294901760, %v2496_v27  ;;  %v5520_v4 = vand.u32 4294901760, %v4951_v49  ;;  %v4994_v21 = vsub.f32 %v298_v48, %v4968_v11 }
 0x14a   :  { %2437 = vmatpush.msrb.mxu0 %v4848_v18  ;;  %2581 = vmatpush.msrb.mxu2 %v4863_v16  ;;  %v3118_v31 = vmul.f32 %v1409_v19, %v253_v10  ;;  %v2508_v46 = vsub.f32 %v4924_v32, %v5524_v61  ;;  %v4996_v41 = vand.u32 4294901760, %v290_v54  ;;  %v5003_v25 = vand.u32 4294901760, %v282_v13  ;;  %v266_v19 = vld [vmem:[#allocation2 + $0x30] sm:$0xff] }
 0x14b   :  { %2631 = vmatpush.msrb.mxu3 %v4829_v30  ;;  %2320 = vmatpush.msra.mxu1 %v4723_v52  ;;  %v2502_v52 = vsub.f32 %v4905_v14, %v5525_v22  ;;  %v4971_v29 = vmul.f32 19.085537, %v4941_v3  ;;  %v2520_v58 = vsub.f32 %v4951_v49, %v5520_v4  ;;  %v2515_v10 = vand.u32 4294901760, %v2514_v7 }
 0x14c   :  { %2439 = vmatpush.msrb.mxu0 %v4865_v51  ;;  %3126 = vst [vmem:[#allocation10 + $0x10] sm:$0xff] %v3118_v31  ;;  %2584 = vmatpush.msrb.mxu2 %v4888_v35  ;;  %v2509_v5 = vand.u32 4294901760, %v2508_v46  ;;  %v2526_v9 = vsub.f32 %v4962_v1, %v5519_v40  ;;  %v5522_v28 = vand.u32 4294901760, %v4991_v62  ;;  %v5018_v31 = vsub.f32 %v290_v54, %v4996_v41  ;;  %v363_v40 = vld [vmem:[#allocation2 + $0x338] sm:$0xff] }
 0x14d   :  { %2480 = vmatpush.msrb.mxu1 %v2479_v39  ;;  %2633 = vmatpush.msrb.mxu3 %v4848_v18  ;;  %v2503_v63 = vand.u32 4294901760, %v2502_v52  ;;  %5683 = vst [vmem:[#allocation17_spill] sm:$0xff] %v4996_v41  ;;  %v4999_v56 = vadd.f32 1.0, %v4971_v29  ;;  %v5518_v39 = vand.u32 4294901760, %v4981_v23  ;;  %v5025_v48 = vsub.f32 %v282_v13, %v5003_v25 }
 0x14e   :  { %2393 = vmatmul.f32.vlgmr.msra.gmra.mxu2 %v5671_v15  ;;  %2441 = vmatpush.msrb.mxu0 %v4875_v8  ;;  %5684 = vst [vmem:[#allocation16_spill] sm:$0xff] %v5003_v25  ;;  %v5027_v27 = vand.u32 4294901760, %v274_v24  ;;  %v161_v52 = vmul.f32 -0.5, %v4971_v29  ;;  %v5036_v46 = vand.u32 4294901760, %v387_v50  ;;  %v5040_v13 = vand.u32 4294901760, %v379_v45 }
 0x14f   :  { %2486 = vmatpush.msrb.mxu1 %v2485_v60  ;;  %2587 = vmatpush.msrb.mxu2 %v4897_v6  ;;  %v5523_v60 = vand.u32 4294901760, %v4994_v21  ;;  %3164 = vlog2.f32 %v4999_v56  ;;  %v2532_v54 = vsub.f32 %v4981_v23, %v5518_v39  ;;  %v2538_v7 = vsub.f32 %v4991_v62, %v5522_v28  ;;  %v371_v39 = vld [vmem:[#allocation2 + $0x378] sm:$0xff] }
 0x150   :  { %2635 = vmatpush.msrb.mxu3 %v4865_v51  ;;  %2285 = vmatmul.f32.vlgmr.msra.gmra.mxu0 %v5663_v42  ;;  %5685 = vst [vmem:[#allocation19_spill] sm:$0xff] %v5027_v27  ;;  %v5053_v4 = vsub.f32 %v274_v24, %v5027_v27  ;;  %v5061_v61 = vsub.f32 %v387_v50, %v5036_v46  ;;  %v164_v22 = vand.u32 2147483647, %v4971_v29  ;;  %v5066_v24 = vand.u32 4294901760, %v371_v39 }
 0x151   :  { %2430 = vmatmul.f32.vlgmr.msra.gmra.mxu3 %v5671_v15  ;;  %2443 = vmatpush.msrb.mxu0 %v4879_v17  ;;  %v2533_v28 = vand.u32 4294901760, %v2532_v54  ;;  %v5071_v38 = vand.u32 4294901760, %v363_v40  ;;  %v214_v42 = vmul.f32 0.5, %v4941_v3  ;;  %vm246_vm7 = vcmp.lt.f32.partialorder %v4941_v3, 1.0 }
 0x152   :  { %2492 = vmatpush.msrb.mxu1 %v2491_v55  ;;  %2590 = vmatpush.msrb.mxu2 %v4905_v14  ;;  %v2521_v55 = vand.u32 4294901760, %v2520_v58  ;;  %v5530_v58 = vand.u32 4294901760, %v5018_v31  ;;  %5686 = vst [vmem:[#allocation18_spill] sm:$0xff] %v5061_v61  ;;  %v5535_v59 = vand.u32 4294901760, %v5053_v4  ;;  %vm5089_vm6 = vcmp.lt.f32.partialorder %v164_v22, 0.0004427343 }
 0x153   :  { %2637 = vmatpush.msrb.mxu3 %v4875_v8  ;;  %2324 = vmatmul.f32.vlgmr.msra.gmra.mxu1 %v5667_v0 }
 0x154   :  { %2445 = vmatpush.msrb.mxu0 %v4899_v43  ;;  %2498 = vmatpush.msrb.mxu1 %v2497_v34  ;;  %v5034_v34 = vand.u32 4294901760, %v266_v19  ;;  %v2550_v54 = vsub.f32 %v5018_v31, %v5530_v58 }
 0x155   :  { %2593 = vmatpush.msrb.mxu2 %v4924_v32  ;;  %2639 = vmatpush.msrb.mxu3 %v4879_v17  ;;  %v3165_v44 = vpop.eup %3164 }
 0x156   :  { %2447 = vmatpush.msrb.mxu0 %v4907_v2  ;;  %2504 = vmatpush.msrb.mxu1 %v2503_v63  ;;  %v2527_v63 = vand.u32 4294901760, %v2526_v9  ;;  %v162_v9 = vadd.f32 1.0, %v161_v52  ;;  %v5069_v52 = vsub.f32 %v379_v45, %v5040_v13  ;;  %v160_v47 = vmul.f32 0.6931472, %v3165_v44 }
 0x157   :  { %2596 = vmatpush.msrb.mxu2 %v4932_v57  ;;  %2641 = vmatpush.msrb.mxu3 %v4899_v43  ;;  %v2551_v22 = vand.u32 4294901760, %v2550_v54 }
 0x158   :  { %2449 = vmatpush.msrb.mxu0 %v4926_v37  ;;  %2510 = vmatpush.msrb.mxu1 %v2509_v5  ;;  %v2544_v5 = vsub.f32 %v4994_v21, %v5523_v60  ;;  %v5058_v60 = vsub.f32 %v266_v19, %v5034_v34  ;;  %5687 = vst [vmem:[#allocation24_spill] sm:$0xff] %v5069_v52  ;;  %v2539_v19 = vand.u32 4294901760, %v2538_v7  ;;  %v126_v7 = vmul.f32 0.026197849, %v4999_v56 }
 0x159   :  { %2599 = vmatpush.msrb.mxu2 %v4951_v49  ;;  %2643 = vmatpush.msrb.mxu3 %v4907_v2  ;;  %v5693_v15 = vand.u32 4294901760, %v5069_v52 }
 0x15a   :  { %2451 = vmatpush.msrb.mxu0 %v4934_v33  ;;  %2516 = vmatpush.msrb.mxu1 %v2515_v10  ;;  %v5532_v10 = vand.u32 4294901760, %v5025_v48  ;;  %v2545_v50 = vand.u32 4294901760, %v2544_v5  ;;  %v5692_v56 = vand.u32 4294901760, %v5058_v60 }
 0x15b   :  { %2602 = vmatpush.msrb.mxu2 %v4962_v1  ;;  %2645 = vmatpush.msrb.mxu3 %v4926_v37 }
 0x15c   :  { %2453 = vmatpush.msrb.mxu0 %v4953_v26  ;;  %2522 = vmatpush.msrb.mxu1 %v2521_v55  ;;  %v355_v55 = vld [vmem:[#allocation2 + $0x2f8] sm:$0xff]  ;;  %v2556_v45 = vsub.f32 %v5025_v48, %v5532_v10  ;;  %v2568_v0 = vsub.f32 %v5058_v60, %v5692_v56 }
 0x15d   :  { %2605 = vmatpush.msrb.mxu2 %v4981_v23  ;;  %2647 = vmatpush.msrb.mxu3 %v4934_v33  ;;  %v5087_v58 = vand.u32 4294901760, %v355_v55  ;;  %v339_v10 = vld [vmem:[#allocation2 + $0x278] sm:$0xff] }
 0x15e   :  { %2455 = vmatpush.msrb.mxu0 %v4966_v53  ;;  %2528 = vmatpush.msrb.mxu1 %v2527_v63  ;;  %v163_v63 = vmul.f32 %v162_v9, %v4971_v29  ;;  %v5097_v29 = vsub.f32 %v371_v39, %v5066_v24  ;;  %v5102_v9 = vand.u32 4294901760, %v347_v36  ;;  %v2557_v44 = vand.u32 4294901760, %v2556_v45 }
 0x15f   :  { %2608 = vmatpush.msrb.mxu2 %v4991_v62  ;;  %2649 = vmatpush.msrb.mxu3 %v4953_v26  ;;  %v5121_v45 = vsub.f32 %v355_v55, %v5087_v58  ;;  %v5123_v20 = vand.u32 4294901760, %v339_v10 }
 0x160   :  { %2457 = vmatpush.msrb.mxu0 %v4968_v11  ;;  %2534 = vmatpush.msrb.mxu1 %v2533_v28  ;;  %5690 = vst [vmem:[#allocation25_spill] sm:$0xff] %v5097_v29  ;;  %v5100_v28 = vsub.f32 %v363_v40, %v5071_v38  ;;  %v2562_v40 = vsub.f32 %v5053_v4, %v5535_v59  ;;  %v331_v59 = vld [vmem:[#allocation2 + $0x238] sm:$0xff] }
 0x161   :  { %2611 = vmatpush.msrb.mxu2 %v4994_v21  ;;  %2651 = vmatpush.msrb.mxu3 %v4966_v53  ;;  %v166_v39 = vsel %vm5089_vm6, %v163_v63, %v160_v47  ;;  %v5130_v47 = vsub.f32 %v5069_v52, %v5693_v15  ;;  %v5135_v55 = vsub.f32 %v347_v36, %v5102_v9  ;;  %v5694_v52 = vand.u32 4294901760, %v5097_v29 }
 0x162   :  { %2459 = vmatpush.msrb.mxu0 %v4996_v41  ;;  %2540 = vmatpush.msrb.mxu1 %v2539_v19  ;;  %v1449_v5 = vpop.f32.mrf.mxu2  ;;  %v5691_v19 = vand.u32 4294901760, %v5061_v61  ;;  %v2563_v15 = vand.u32 4294901760, %v2562_v40 }
 0x163   :  { %2614 = vmatpush.msrb.mxu2 %v5018_v31  ;;  %2653 = vmatpush.msrb.mxu3 %v4968_v11  ;;  %v323_v11 = vld [vmem:[#allocation2 + $0x1f8] sm:$0xff]  ;;  %v2826_v40 = vand.u32 4294901760, %v5130_v47 }
 0x164   :  { %2461 = vmatpush.msrb.mxu0 %v5003_v25  ;;  %2546 = vmatpush.msrb.mxu1 %v2545_v50  ;;  %v2819_v54 = vsub.f32 %v5061_v61, %v5691_v19  ;;  %v206_v61 = vmul.f32 %v166_v39, %v126_v7  ;;  %v5142_v19 = vand.u32 4294901760, %v331_v59  ;;  %v315_v39 = vld [vmem:[#allocation2 + $0x1b8] sm:$0xff] }
 0x165   :  { %2617 = vmatpush.msrb.mxu2 %v5025_v48  ;;  %2655 = vmatpush.msrb.mxu3 %v4996_v41  ;;  %v1550_v63 = vpop.f32.mrf.mxu3  ;;  %v230_v41 = vmul.f32 1.5, %v4941_v3 }
 0x166   :  { %2463 = vmatpush.msrb.mxu0 %v5027_v27  ;;  %2552 = vmatpush.msrb.mxu1 %v2551_v22  ;;  %v1551_v56 = vadd.f32 %v1550_v63, %v1449_v5  ;;  %v2820_v36 = vand.u32 4294901760, %v2819_v54  ;;  %v5147_v5 = vsub.f32 %v339_v10, %v5123_v20  ;;  %v2569_v63 = vand.u32 4294901760, %v2568_v0 }
 0x167   :  { %2620 = vmatpush.msrb.mxu2 %v5053_v4  ;;  %2657 = vmatpush.msrb.mxu3 %v5003_v25  ;;  %v1604_v50 = vpop.f32.mrf.mxu0  ;;  %v2831_v25 = vsub.f32 %v5097_v29, %v5694_v52  ;;  %v5695_v54 = vand.u32 4294901760, %v4846_v12  ;;  %v5696_v10 = vand.u32 4294901760, %v5100_v28  ;;  %v222_v7 = vsub.f32 %v206_v61, %v214_v42 }
 0x168   :  { %2465 = vmatpush.msrb.mxu0 %v5034_v34  ;;  %2558 = vmatpush.msrb.mxu1 %v2557_v44  ;;  %v1605_v22 = vadd.f32 %v1604_v50, %v1551_v56  ;;  %v5155_v44 = vand.u32 4294901760, %v323_v11  ;;  %v238_v47 = vadd.f32 -0.42140645, %v230_v41  ;;  %v5167_v12 = vsub.f32 %v331_v59, %v5142_v19 }
 0x169   :  { %2623 = vmatpush.msrb.mxu2 %v5058_v60  ;;  %2659 = vmatpush.msrb.mxu3 %v5027_v27  ;;  %v2837_v50 = vsub.f32 %v5100_v28, %v5696_v10  ;;  %v307_v27 = vld [vmem:[#allocation2 + $0x178] sm:$0xff]  ;;  %v5697_v10 = vand.u32 4294901760, %v4863_v16  ;;  %v5698_v42 = vand.u32 4294901760, %v5121_v45  ;;  %v5699_v16 = vand.u32 4294901760, %v4888_v35 }
 0x16a   :  { %2672 = vmatpush.msra.mxu0 %v5695_v54  ;;  %v1643_v56 = vpop.f32.mrf.mxu1  ;;  %2564 = vmatpush.msrb.mxu1 %v2563_v15  ;;  %v5169_v54 = vand.u32 4294901760, %v315_v39  ;;  %v299_v15 = vld [vmem:[#allocation2 + $0x138] sm:$0xff]  ;;  %v5179_v59 = vsub.f32 %v323_v11, %v5155_v44  ;;  %v5181_v0 = vand.u32 4294901760, %v307_v27 }
 0x16b   :  { %2776 = vmatpush.msra.mxu2 %v5036_v46  ;;  %2661 = vmatpush.msrb.mxu3 %v5034_v34  ;;  %v1644_v52 = vadd.f32 %v1643_v56, %v1605_v22  ;;  %v1712_v29 = vpop.f32.mrf.mxu2  ;;  %v2843_v61 = vsub.f32 %v5121_v45, %v5698_v42  ;;  %v2832_v22 = vand.u32 4294901760, %v2831_v25  ;;  %v5700_v42 = vand.u32 4294901760, %v5135_v55 }
 0x16c   :  { %2676 = vmatpush.msra.mxu0 %v5697_v10  ;;  %2570 = vmatpush.msrb.mxu1 %v2569_v63  ;;  %v2838_v10 = vand.u32 4294901760, %v2837_v50  ;;  %v2860_v63 = vand.u32 4294901760, %v5167_v12  ;;  %v5194_v35 = vsub.f32 %v315_v39, %v5169_v54  ;;  %v5701_v50 = vand.u32 4294901760, %v4897_v6 }
 0x16d   :  { %2778 = vmatpush.msra.mxu2 %v5040_v13  ;;  %2821 = vmatpush.msra.mxu3 %v2820_v36  ;;  %v1713_v56 = vadd.f32 %v1712_v29, %v1644_v52  ;;  %v2849_v41 = vsub.f32 %v5135_v55, %v5700_v42  ;;  %v254_v36 = vsel %vm246_vm7, %v222_v7, %v238_v47  ;;  %v291_v29 = vld [vmem:[#allocation2 + $0xf8] sm:$0xff]  ;;  %v2844_v3 = vand.u32 4294901760, %v2843_v61 }
 0x16e   :  { %2680 = vmatpush.msra.mxu0 %v5699_v16  ;;  %2739 = vmatpush.msra.mxu1 %v4829_v30  ;;  %v1749_v25 = vpop.f32.mrf.mxu3  ;;  %v5196_v30 = vand.u32 4294901760, %v299_v15  ;;  %v5702_v7 = vand.u32 4294901760, %v5147_v5  ;;  %v283_v52 = vld [vmem:[#allocation2 + $0xb8] sm:$0xff]  ;;  %v2866_v39 = vand.u32 4294901760, %v5179_v59  ;;  %v5209_v16 = vand.u32 4294901760, %v291_v29 }
 0x16f   :  { %2780 = vmatpush.msra.mxu2 %v5066_v24  ;;  %2827 = vmatpush.msra.mxu3 %v2826_v40  ;;  %v1750_v11 = vadd.f32 %v1749_v25, %v1713_v56  ;;  %v5207_v56 = vsub.f32 %v307_v27, %v5181_v0  ;;  %v5703_v6 = vand.u32 4294901760, %v4905_v14  ;;  %v2861_v61 = vsub.f32 %v5167_v12, %v2860_v63  ;;  %v275_v14 = vld [vmem:[#allocation2 + $0x78] sm:$0xff] }
 0x170   :  { %2684 = vmatpush.msra.mxu0 %v5701_v50  ;;  %2741 = vmatpush.msra.mxu1 %v4848_v18  ;;  %v2855_v47 = vsub.f32 %v5147_v5, %v5702_v7  ;;  %v2850_v18 = vand.u32 4294901760, %v2849_v41  ;;  %v5220_v27 = vsub.f32 %v299_v15, %v5196_v30  ;;  %v5222_v42 = vand.u32 4294901760, %v283_v52 }
 0x171   :  { %2782 = vmatpush.msra.mxu2 %v5071_v38  ;;  %2833 = vmatpush.msra.mxu3 %v2832_v22  ;;  %v3119_v40 = vmul.f32 %v1750_v11, %v254_v36  ;;  %v2872_v22 = vand.u32 4294901760, %v5194_v35  ;;  %v5704_v36 = vand.u32 4294901760, %v4924_v32  ;;  %v2867_v41 = vsub.f32 %v5179_v59, %v2866_v39 }
 0x172   :  { %2688 = vmatpush.msra.mxu0 %v5703_v6  ;;  %2743 = vmatpush.msra.mxu1 %v4865_v51  ;;  %v2856_v51 = vand.u32 4294901760, %v2855_v47  ;;  %v5233_v15 = vsub.f32 %v291_v29, %v5209_v16  ;;  %v5705_v25 = vand.u32 4294901760, %v4932_v57  ;;  %v5238_v32 = vand.u32 4294901760, %v275_v14 }
 0x173   :  { %2784 = vmatpush.msra.mxu2 %v5087_v58  ;;  %2839 = vmatpush.msra.mxu3 %v2838_v10  ;;  %3127 = vst [vmem:[#allocation10 + $0x18] sm:$0xff] %v3119_v40  ;;  %v2878_v10 = vand.u32 4294901760, %v5207_v56  ;;  %v2862_v11 = vand.u32 4294901760, %v2861_v61  ;;  %v2873_v50 = vsub.f32 %v5194_v35, %v2872_v22  ;;  %v5246_v29 = vsub.f32 %v283_v52, %v5222_v42 }
 0x174   :  { %2692 = vmatpush.msra.mxu0 %v5704_v36  ;;  %2745 = vmatpush.msra.mxu1 %v4875_v8  ;;  %v267_v8 = vld [vmem:[#allocation2 + $0x38] sm:$0xff]  ;;  %v5706_v57 = vand.u32 4294901760, %v4951_v49  ;;  %v2890_v47 = vand.u32 4294901760, %v5233_v15  ;;  %v5707_v52 = vand.u32 4294901760, %v4962_v1  ;;  %v5262_v49 = vsub.f32 %v275_v14, %v5238_v32 }
 0x175   :  { %2786 = vmatpush.msra.mxu2 %v5102_v9  ;;  %2845 = vmatpush.msra.mxu3 %v2844_v3  ;;  %v2884_v3 = vand.u32 4294901760, %v5220_v27  ;;  %v2879_v7 = vsub.f32 %v5207_v56, %v2878_v10  ;;  %v5256_v40 = vand.u32 4294901760, %v267_v8  ;;  %v5708_v61 = vand.u32 4294901760, %v4981_v23 }
 0x176   :  { %2696 = vmatpush.msra.mxu0 %v5705_v25  ;;  %2747 = vmatpush.msra.mxu1 %v4879_v17  ;;  %v2868_v17 = vand.u32 4294901760, %v2867_v41  ;;  %v2891_v1 = vsub.f32 %v5233_v15, %v2890_v47  ;;  %v5709_v36 = vand.u32 4294901760, %v4991_v62  ;;  %v2902_v23 = vand.u32 4294901760, %v5262_v49 }
 0x177   :  { %2788 = vmatpush.msra.mxu2 %v5123_v20  ;;  %2851 = vmatpush.msra.mxu3 %v2850_v18  ;;  %v2885_v6 = vsub.f32 %v5220_v27, %v2884_v3  ;;  %v2896_v18 = vand.u32 4294901760, %v5246_v29  ;;  %v5277_v14 = vsub.f32 %v267_v8, %v5256_v40  ;;  %v5710_v41 = vand.u32 4294901760, %v4994_v21 }
 0x178   :  { %2700 = vmatpush.msra.mxu0 %v5706_v57  ;;  %2749 = vmatpush.msra.mxu1 %v4899_v43  ;;  %v2874_v43 = vand.u32 4294901760, %v2873_v50  ;;  %v2892_v62 = vand.u32 4294901760, %v2891_v1  ;;  %v5711_v25 = vand.u32 4294901760, %v5018_v31  ;;  %v2903_v8 = vsub.f32 %v5262_v49, %v2902_v23  ;;  %v79_v50 = vld [vmem:[#allocation7 + $0x20] sm:$0xff]  ;;  %v5720_v1 = vld [vmem:[#allocation22_spill] sm:$0xff] }
 0x179   :  { %2790 = vmatpush.msra.mxu2 %v5142_v19  ;;  %2857 = vmatpush.msra.mxu3 %v2856_v51  ;;  %v2897_v51 = vsub.f32 %v5246_v29, %v2896_v18  ;;  %v87_v57 = vld [vmem:[#allocation8 + $0x20] sm:$0xff] }
 0x17a   :  { %2704 = vmatpush.msra.mxu0 %v5707_v52  ;;  %2751 = vmatpush.msra.mxu1 %v4907_v2  ;;  %v2880_v2 = vand.u32 4294901760, %v2879_v7  ;;  %v95_v31 = vsub.f32 %v79_v50, %v87_v57  ;;  %v5715_v7 = vld [vmem:[#allocation17_spill] sm:$0xff]  ;;  %v2904_v52 = vand.u32 4294901760, %v2903_v8 }
 0x17b   :  { %2792 = vmatpush.msra.mxu2 %v5155_v44  ;;  %2863 = vmatpush.msra.mxu3 %v2862_v11  ;;  %v2898_v21 = vand.u32 4294901760, %v2897_v51  ;;  %v5713_v11 = vld [vmem:[#allocation15_spill] sm:$0xff]  ;;  %v5727_v8 = vld [vmem:[#allocation25_spill] sm:$0xff] }
 0x17c   :  { %2708 = vmatpush.msra.mxu0 %v5708_v61  ;;  %2753 = vmatpush.msra.mxu1 %v4926_v37  ;;  %v2886_v37 = vand.u32 4294901760, %v2885_v6  ;;  %v5718_v6 = vld [vmem:[#allocation16_spill] sm:$0xff]  ;;  %v5723_v51 = vld [vmem:[#allocation19_spill] sm:$0xff] }
 0x17d   :  { %2794 = vmatpush.msra.mxu2 %v5169_v54  ;;  %2869 = vmatpush.msra.mxu3 %v2868_v17  ;;  %v5714_v17 = vand.u32 4294901760, %v5053_v4  ;;  %v5719_v4 = vld [vmem:[#allocation23_spill] sm:$0xff] }
 0x17e   :  { %2712 = vmatpush.msra.mxu0 %v5709_v36  ;;  %2755 = vmatpush.msra.mxu1 %v4934_v33  ;;  %v2908_v33 = vand.u32 4294901760, %v5277_v14  ;;  %v5721_v36 = vld [vmem:[#allocation18_spill] sm:$0xff] }
 0x17f   :  { %2796 = vmatpush.msra.mxu2 %v5181_v0  ;;  %2875 = vmatpush.msra.mxu3 %v2874_v43  ;;  %v5717_v43 = vand.u32 4294901760, %v5058_v60  ;;  %v5724_v60 = vld [vmem:[#allocation20_spill] sm:$0xff] }
 0x180   :  { %2716 = vmatpush.msra.mxu0 %v5710_v41  ;;  %2757 = vmatpush.msra.mxu1 %v4953_v26  ;;  %v5712_v26 = vand.u32 4294901760, %v5025_v48  ;;  %v5716_v48 = vld [vmem:[#allocation21_spill] sm:$0xff] }
 0x181   :  { %2798 = vmatpush.msra.mxu2 %v5196_v30  ;;  %2881 = vmatpush.msra.mxu3 %v2880_v2  ;;  %v5315_v2 = vand.u32 2147483647, %v95_v31 }
 0x182   :  { %2720 = vmatpush.msra.mxu0 %v5711_v25  ;;  %2759 = vmatpush.msra.mxu1 %v4966_v53  ;;  %v2909_v53 = vsub.f32 %v5277_v14, %v2908_v33 }
 0x183   :  { %2800 = vmatpush.msra.mxu2 %v5209_v16  ;;  %2887 = vmatpush.msra.mxu3 %v2886_v37  ;;  %v5722_v37 = vand.u32 4294901760, %v5721_v36  ;;  %v111_v41 = vmul.f32 19.085537, %v5315_v2  ;;  %vm247_vm9 = vcmp.lt.f32.partialorder %v5315_v2, 1.0 }
 0x184   :  { %2724 = vmatpush.msra.mxu0 %v5712_v26  ;;  %2761 = vmatpush.msra.mxu1 %v5713_v11  ;;  %v2910_v61 = vand.u32 4294901760, %v2909_v53  ;;  %v5729_v11 = vand.u32 4294901760, %v5100_v28 }
 0x185   :  { %2802 = vmatpush.msra.mxu2 %v5222_v42  ;;  %2893 = vmatpush.msra.mxu3 %v2892_v62  ;;  %v5725_v62 = vld [vmem:[#allocation24_spill] sm:$0xff]  ;;  %v119_v26 = vadd.f32 1.0, %v111_v41 }
 0x186   :  { %2728 = vmatpush.msra.mxu0 %v5714_v17  ;;  %2763 = vmatpush.msra.mxu1 %v5715_v7  ;;  %v5726_v25 = vand.u32 4294901760, %v5725_v62 }
 0x187   :  { %2804 = vmatpush.msra.mxu2 %v5238_v32  ;;  %2899 = vmatpush.msra.mxu3 %v2898_v21  ;;  %v5728_v21 = vand.u32 4294901760, %v5727_v8  ;;  %3166 = vlog2.f32 %v119_v26 }
 0x188   :  { %2626 = vmatmul.f32.vlgmr.msrb.gmra.mxu2 %v5716_v48  ;;  %2732 = vmatpush.msra.mxu0 %v5717_v43 }
 0x189   :  { %2765 = vmatpush.msra.mxu1 %v5718_v6  ;;  %2806 = vmatpush.msra.mxu2 %v5256_v40 }
 0x18a   :  { %2905 = vmatpush.msra.mxu3 %v2904_v52  ;;  %2471 = vmatmul.f32.vlgmr.msrb.gmra.mxu0 %v5719_v4 }
 0x18b   :  { %2665 = vmatmul.f32.vlgmr.msrb.gmra.mxu3 %v5720_v1  ;;  %2919 = vmatpush.msrb.mxu0 %v5721_v36 }
 0x18c   :  { %3013 = vmatpush.msrb.mxu2 %v5722_v37  ;;  %2767 = vmatpush.msra.mxu1 %v5723_v51 }
 0x18d   :  { %2911 = vmatpush.msra.mxu3 %v2910_v61  ;;  %2572 = vmatmul.f32.vlgmr.msrb.gmra.mxu1 %v5724_v60 }
 0x18e   :  { %2922 = vmatpush.msrb.mxu0 %v5725_v62  ;;  %3017 = vmatpush.msrb.mxu2 %v5726_v25 }
 0x18f   :  { %3080 = vmatpush.msrb.mxu3 %v5036_v46  ;;  %2769 = vmatpush.msra.mxu1 %v5034_v34  ;;  %v5730_v34 = vand.u32 4294901760, %v5121_v45 }
 0x190   :  { %2925 = vmatpush.msrb.mxu0 %v5727_v8  ;;  %3021 = vmatpush.msrb.mxu2 %v5728_v21 }
 0x191   :  { %2972 = vmatpush.msrb.mxu1 %v5036_v46  ;;  %3082 = vmatpush.msrb.mxu3 %v5040_v13  ;;  %v170_v46 = vmul.f32 -0.5, %v111_v41 }
 0x192   :  { %2928 = vmatpush.msrb.mxu0 %v5100_v28  ;;  %3025 = vmatpush.msrb.mxu2 %v5729_v11  ;;  %v89_v11 = vld [vmem:[#allocation8 + $0x30] sm:$0xff] }
 0x193   :  { %2974 = vmatpush.msrb.mxu1 %v5040_v13  ;;  %3084 = vmatpush.msrb.mxu3 %v5066_v24  ;;  %v5731_v13 = vand.u32 4294901760, %v5135_v55  ;;  %v171_v28 = vadd.f32 1.0, %v170_v46 }
 0x194   :  { %2734 = vmatmul.f32.vlgmr.msra.gmra.mxu0 %v5724_v60  ;;  %3029 = vmatpush.msrb.mxu2 %v5730_v34 }
 0x195   :  { %2976 = vmatpush.msrb.mxu1 %v5066_v24  ;;  %2931 = vmatpush.msrb.mxu0 %v5121_v45  ;;  %v5732_v24 = vand.u32 4294901760, %v5147_v5  ;;  %v3167_v45 = vpop.eup %3166 }
 0x196   :  { %3086 = vmatpush.msrb.mxu3 %v5071_v38  ;;  %2771 = vmatmul.f32.vlgmr.msra.gmra.mxu1 %v5724_v60 }
 0x197   :  { %2934 = vmatpush.msrb.mxu0 %v5135_v55  ;;  %2978 = vmatpush.msrb.mxu1 %v5071_v38  ;;  %v173_v38 = vand.u32 2147483647, %v111_v41  ;;  %v172_v55 = vmul.f32 %v171_v28, %v111_v41 }
 0x198   :  { %3033 = vmatpush.msrb.mxu2 %v5731_v13  ;;  %3088 = vmatpush.msrb.mxu3 %v5087_v58 }
 0x199   :  { %2937 = vmatpush.msrb.mxu0 %v5147_v5  ;;  %2980 = vmatpush.msrb.mxu1 %v5087_v58  ;;  %v169_v58 = vmul.f32 0.6931472, %v3167_v45  ;;  %vm5369_vm8 = vcmp.lt.f32.partialorder %v173_v38, 0.0004427343  ;;  %v127_v5 = vmul.f32 0.026197849, %v119_v26 }
 0x19a   :  { %3037 = vmatpush.msrb.mxu2 %v5732_v24  ;;  %3090 = vmatpush.msrb.mxu3 %v5102_v9  ;;  %v81_v26 = vld [vmem:[#allocation7 + $0x30] sm:$0xff] }
 0x19b   :  { %2940 = vmatpush.msrb.mxu0 %v5167_v12  ;;  %2982 = vmatpush.msrb.mxu1 %v5102_v9  ;;  %v97_v34 = vsub.f32 %v81_v26, %v89_v11 }
 0x19c   :  { %3041 = vmatpush.msrb.mxu2 %v2860_v63  ;;  %3092 = vmatpush.msrb.mxu3 %v5123_v20 }
 0x19d   :  { %2943 = vmatpush.msrb.mxu0 %v5179_v59  ;;  %2984 = vmatpush.msrb.mxu1 %v5123_v20  ;;  %v105_v46 = vand.u32 2147483647, %v97_v34 }
 0x19e   :  { %3045 = vmatpush.msrb.mxu2 %v2866_v39  ;;  %3094 = vmatpush.msrb.mxu3 %v5142_v19  ;;  %v231_v39 = vmul.f32 1.5, %v5315_v2 }
 0x19f   :  { %2946 = vmatpush.msrb.mxu0 %v5194_v35  ;;  %2986 = vmatpush.msrb.mxu1 %v5142_v19  ;;  %v175_v19 = vsel %vm5369_vm8, %v172_v55, %v169_v58  ;;  %v215_v35 = vmul.f32 0.5, %v5315_v2  ;;  %v113_v13 = vmul.f32 19.085537, %v105_v46  ;;  %vm249_vm13 = vcmp.lt.f32.partialorder %v105_v46, 1.0 }
 0x1a0   :  { %3049 = vmatpush.msrb.mxu2 %v2872_v22  ;;  %3096 = vmatpush.msrb.mxu3 %v5155_v44  ;;  %v207_v63 = vmul.f32 %v175_v19, %v127_v5 }
 0x1a1   :  { %2949 = vmatpush.msrb.mxu0 %v5207_v56  ;;  %2988 = vmatpush.msrb.mxu1 %v5155_v44  ;;  %v1790_v20 = vpop.f32.mrf.mxu0  ;;  %v121_v24 = vadd.f32 1.0, %v113_v13  ;;  %v188_v28 = vmul.f32 -0.5, %v113_v13  ;;  %v191_v58 = vand.u32 2147483647, %v113_v13 }
 0x1a2   :  { %3053 = vmatpush.msrb.mxu2 %v2878_v10  ;;  %3098 = vmatpush.msrb.mxu3 %v5169_v54  ;;  %v239_v10 = vadd.f32 -0.42140645, %v231_v39 }
 0x1a3   :  { %2952 = vmatpush.msrb.mxu0 %v5220_v27  ;;  %2990 = vmatpush.msrb.mxu1 %v5169_v54  ;;  %v223_v27 = vsub.f32 %v207_v63, %v215_v35  ;;  %v189_v45 = vadd.f32 1.0, %v188_v28  ;;  %vm192_vm12 = vcmp.lt.f32.partialorder %v191_v58, 0.0004427343  ;;  %v129_v5 = vmul.f32 0.026197849, %v121_v24 }
 0x1a4   :  { %3057 = vmatpush.msrb.mxu2 %v2884_v3  ;;  %3100 = vmatpush.msrb.mxu3 %v5181_v0  ;;  %v1891_v44 = vpop.f32.mrf.mxu1  ;;  %v88_v3 = vld [vmem:[#allocation8 + $0x28] sm:$0xff]  ;;  %v217_v63 = vmul.f32 0.5, %v105_v46 }
 0x1a5   :  { %2812 = vmatmul.f32.vlgmr.msra.gmra.mxu2 %v5719_v4  ;;  %2913 = vmatmul.f32.vlgmr.msra.gmra.mxu3 %v5724_v60  ;;  %v1892_v12 = vadd.f32 %v1891_v44, %v1790_v20  ;;  %v1945_v59 = vpop.f32.mrf.mxu2  ;;  %v190_v9 = vmul.f32 %v189_v45, %v113_v13  ;;  %v82_v44 = vld [vmem:[#allocation7 + $0x38] sm:$0xff] }
 0x1a6   :  { %2955 = vmatpush.msrb.mxu0 %v5233_v15  ;;  %2992 = vmatpush.msrb.mxu1 %v5181_v0  ;;  %v80_v0 = vld [vmem:[#allocation7 + $0x28] sm:$0xff] }
 0x1a7   :  { %3061 = vmatpush.msrb.mxu2 %v2890_v47  ;;  %3102 = vmatpush.msrb.mxu3 %v5196_v30  ;;  %v1946_v54 = vadd.f32 %v1945_v59, %v1892_v12  ;;  %v90_v12 = vld [vmem:[#allocation8 + $0x38] sm:$0xff] }
 0x1a8   :  { %2958 = vmatpush.msrb.mxu0 %v5246_v29  ;;  %2994 = vmatpush.msrb.mxu1 %v5196_v30  ;;  %v1984_v56 = vpop.f32.mrf.mxu3  ;;  %v96_v29 = vsub.f32 %v80_v0, %v88_v3 }
 0x1a9   :  { %3065 = vmatpush.msrb.mxu2 %v2896_v18  ;;  %3104 = vmatpush.msrb.mxu3 %v5209_v16  ;;  %v1985_v22 = vadd.f32 %v1984_v56, %v1946_v54  ;;  %v233_v56 = vmul.f32 1.5, %v105_v46 }
 0x1aa   :  { %2961 = vmatpush.msrb.mxu0 %v5262_v49  ;;  %2996 = vmatpush.msrb.mxu1 %v5209_v16  ;;  %v255_v16 = vsel %vm247_vm9, %v223_v27, %v239_v10  ;;  %v104_v18 = vand.u32 2147483647, %v96_v29 }
 0x1ab   :  { %3069 = vmatpush.msrb.mxu2 %v2902_v23  ;;  %3106 = vmatpush.msrb.mxu3 %v5222_v42  ;;  %v2053_v30 = vpop.f32.mrf.mxu0 }
 0x1ac   :  { %2964 = vmatpush.msrb.mxu0 %v5277_v14  ;;  %2998 = vmatpush.msrb.mxu1 %v5222_v42  ;;  %v2054_v15 = vadd.f32 %v2053_v30, %v1985_v22  ;;  %v112_v14 = vmul.f32 19.085537, %v104_v18  ;;  %v232_v61 = vmul.f32 1.5, %v104_v18  ;;  %vm248_vm11 = vcmp.lt.f32.partialorder %v104_v18, 1.0 }
 0x1ad   :  { %3073 = vmatpush.msrb.mxu2 %v2908_v33  ;;  %3108 = vmatpush.msrb.mxu3 %v5238_v32  ;;  %v2090_v47 = vpop.f32.mrf.mxu1  ;;  %v98_v22 = vsub.f32 %v82_v44, %v90_v12  ;;  %v241_v30 = vadd.f32 -0.42140645, %v233_v56 }
 0x1ae   :  { %2967 = vmatmul.f32.vlgmr.msrb.gmra.mxu0 %v5716_v48  ;;  %3075 = vmatmul.f32.vlgmr.msrb.gmra.mxu2 %v5724_v60  ;;  %v2091_v49 = vadd.f32 %v2090_v47, %v2054_v15  ;;  %v120_v23 = vadd.f32 1.0, %v112_v14  ;;  %v179_v33 = vmul.f32 -0.5, %v112_v14  ;;  %v182_v53 = vand.u32 2147483647, %v112_v14 }
 0x1af   :  { %3000 = vmatpush.msrb.mxu1 %v5238_v32  ;;  %3110 = vmatpush.msrb.mxu3 %v5256_v40  ;;  %v240_v37 = vadd.f32 -0.42140645, %v232_v61  ;;  %v106_v15 = vand.u32 2147483647, %v98_v22 }
 0x1b0   :  { %3112 = vmatmul.f32.vlgmr.msrb.gmra.mxu3 %v5724_v60  ;;  %v3120_v42 = vmul.f32 %v2091_v49, %v255_v16  ;;  %3168 = vlog2.f32 %v120_v23  ;;  %v180_v50 = vadd.f32 1.0, %v179_v33  ;;  %vm183_vm10 = vcmp.lt.f32.partialorder %v182_v53, 0.0004427343 }
 0x1b1   :  { %3002 = vmatpush.msrb.mxu1 %v5256_v40  ;;  %v128_v7 = vmul.f32 0.026197849, %v120_v23  ;;  %v216_v40 = vmul.f32 0.5, %v104_v18  ;;  %3170 = vlog2.f32 %v121_v24  ;;  %v218_v61 = vmul.f32 0.5, %v106_v15 }
 0x1b2   :  { %3006 = vmatmul.f32.vlgmr.msrb.gmra.mxu1 %v5720_v1  ;;  %3128 = vst [vmem:[#allocation10 + $0x20] sm:$0xff] %v3120_v42  ;;  %v181_v32 = vmul.f32 %v180_v50, %v112_v14  ;;  %v114_v42 = vmul.f32 19.085537, %v106_v15  ;;  %vm250_vm15 = vcmp.lt.f32.partialorder %v106_v15, 1.0 }
 0x1b4   :  { %v122_v23 = vadd.f32 1.0, %v114_v42  ;;  %v197_v33 = vmul.f32 -0.5, %v114_v42  ;;  %v200_v53 = vand.u32 2147483647, %v114_v42 }
 0x1b6   :  { %v3169_v57 = vpop.eup %3168  ;;  %3172 = vlog2.f32 %v122_v23  ;;  %v198_v50 = vadd.f32 1.0, %v197_v33  ;;  %vm201_vm14 = vcmp.lt.f32.partialorder %v200_v53, 0.0004427343 }
 0x1b7   :  { %v178_v31 = vmul.f32 0.6931472, %v3169_v57  ;;  %v3171_v38 = vpop.eup %3170 }
 0x1b8   :  { %v187_v55 = vmul.f32 0.6931472, %v3171_v38 }
 0x1b9   :  { %v184_v52 = vsel %vm183_vm10, %v181_v32, %v178_v31  ;;  %v199_v32 = vmul.f32 %v198_v50, %v114_v42 }
 0x1ba   :  { %v208_v6 = vmul.f32 %v184_v52, %v128_v7  ;;  %v193_v19 = vsel %vm192_vm12, %v190_v9, %v187_v55 }
 0x1bb   :  { %v209_v54 = vmul.f32 %v193_v19, %v129_v5 }
 0x1bc   :  { %v224_v36 = vsub.f32 %v208_v6, %v216_v40  ;;  %v3173_v57 = vpop.eup %3172 }
 0x1bd   :  { %v225_v3 = vsub.f32 %v209_v54, %v217_v63  ;;  %v196_v31 = vmul.f32 0.6931472, %v3173_v57 }
 0x1be   :  { %v256_v62 = vsel %vm248_vm11, %v224_v36, %v240_v37 }
 0x1bf   :  { %v257_v47 = vsel %vm249_vm13, %v225_v3, %v241_v30 }
 0x1c8   :  { %v2131_v17 = vpop.f32.mrf.mxu2 }
 0x1cb   :  { %v2232_v48 = vpop.f32.mrf.mxu3 }
 0x1cc   :  { %v2233_v43 = vadd.f32 %v2232_v48, %v2131_v17  ;;  %v130_v17 = vmul.f32 0.026197849, %v122_v23  ;;  %v202_v48 = vsel %vm201_vm14, %v199_v32, %v196_v31 }
 0x1cd   :  { %v2286_v2 = vpop.f32.mrf.mxu0 }
 0x1ce   :  { %v2287_v4 = vadd.f32 %v2286_v2, %v2233_v43  ;;  %v210_v40 = vmul.f32 %v202_v48, %v130_v17  ;;  %v234_v2 = vmul.f32 1.5, %v106_v15 }
 0x1d0   :  { %v2325_v1 = vpop.f32.mrf.mxu1  ;;  %v226_v36 = vsub.f32 %v210_v40, %v218_v61  ;;  %v242_v37 = vadd.f32 -0.42140645, %v234_v2 }
 0x1d1   :  { %v2326_v51 = vadd.f32 %v2325_v1, %v2287_v4  ;;  %v2394_v60 = vpop.f32.mrf.mxu2 }
 0x1d3   :  { %v2395_v41 = vadd.f32 %v2394_v60, %v2326_v51 }
 0x1d4   :  { %v2431_v25 = vpop.f32.mrf.mxu3 }
 0x1d5   :  { %v2432_v8 = vadd.f32 %v2431_v25, %v2395_v41 }
 0x1d7   :  { %v3121_v21 = vmul.f32 %v2432_v8, %v256_v62  ;;  %v258_v62 = vsel %vm250_vm15, %v226_v36, %v242_v37 }
 0x1d9   :  { %3129 = vst [vmem:[#allocation10 + $0x28] sm:$0xff] %v3121_v21 }
 0x207   :  { %v2472_v20 = vpop.f32.mrf.mxu0 }
 0x20a   :  { %v2573_v59 = vpop.f32.mrf.mxu1 }
 0x20b   :  { %v2574_v35 = vadd.f32 %v2573_v59, %v2472_v20  ;;  %v2627_v39 = vpop.f32.mrf.mxu2 }
 0x20d   :  { %v2628_v27 = vadd.f32 %v2627_v39, %v2574_v35 }
 0x20e   :  { %v2666_v10 = vpop.f32.mrf.mxu3 }
 0x20f   :  { %v2667_v0 = vadd.f32 %v2666_v10, %v2628_v27 }
 0x211   :  { %v2735_v29 = vpop.f32.mrf.mxu0 }
 0x212   :  { %v2736_v16 = vadd.f32 %v2735_v29, %v2667_v0 }
 0x213   :  { %v2772_v49 = vpop.f32.mrf.mxu1 }
 0x214   :  { %v2773_v18 = vadd.f32 %v2772_v49, %v2736_v16 }
 0x216   :  { %v3122_v14 = vmul.f32 %v2773_v18, %v257_v47 }
 0x218   :  { %3130 = vst [vmem:[#allocation10 + $0x30] sm:$0xff] %v3122_v14 }
 0x228   :  { %v2813_v7 = vpop.f32.mrf.mxu2  ;;  %v2914_v52 = vpop.f32.mrf.mxu3 }
 0x229   :  { %v2915_v43 = vadd.f32 %v2914_v52, %v2813_v7 }
 0x22b   :  { %v2968_v6 = vpop.f32.mrf.mxu0 }
 0x22c   :  { %v2969_v4 = vadd.f32 %v2968_v6, %v2915_v43 }
 0x22f   :  { %v3007_v1 = vpop.f32.mrf.mxu1 }
 0x230   :  { %v3008_v51 = vadd.f32 %v3007_v1, %v2969_v4 }
 0x231   :  { %v3076_v60 = vpop.f32.mrf.mxu2 }
 0x232   :  { %v3077_v41 = vadd.f32 %v3076_v60, %v3008_v51 }
 0x233   :  { %v3113_v25 = vpop.f32.mrf.mxu3 }
 0x234   :  { %v3114_v8 = vadd.f32 %v3113_v25, %v3077_v41 }
 0x236   :  { %v3123_v21 = vmul.f32 %v3114_v8, %v258_v62 }
 0x238   :  { %3131 = vst [vmem:[#allocation10 + $0x38] sm:$0xff] %v3123_v21 }
 0x239   :  { %3142 = dma.vmem_to_hbm [thread:$0]  %s3138_s3, 1024, %s3140_s11, [#allocation4]  }
 0x23a   :  { %3300 = dma.done.wait [#allocation4], 1024  }
 0x23b   :  { %3301 = vsyncadd [#allocation4], 4294966272 }
 0x23c   :  { %3147 = vsyncpa [#allocation3], 1 }
 0x23d   :  { %3148 = vsyncpa [#allocation6], 1 }
 0x23e   :  { %3149 = vsyncpa [#allocation9], 1 }
 0x23f   :  { %3150 = vsyncpa [#allocation4], 1 }

</bundles_post_ra>
